<compile_context>
chip_gen: v6e
topology: v6e:2x2x1
jax: 0.10.0
libtpu: 0.0.40
codegen_flags: <defaults>
</compile_context>

<pallas_src>
import jax
import jax.numpy as jnp
from jax.experimental import pallas as pl
from jax.experimental.pallas import tpu as pltpu

HIDDEN = 32
NUM_LAYERS = 3
INPUT_SIZE = 3
K0_PAD = 8                                    # layer-0 K padded 3 -> 8 (sublane tile)
# Synthetic vocab sizes (len(ID_TO_NOTE), len(ID_TO_OFFSET), len(ID_TO_DURATION)).
N_NOTES = 24
N_OFFSETS = 16
N_DURATIONS = 12
N_HEADS = N_NOTES + N_OFFSETS + N_DURATIONS   # 52
HEAD_PAD = 128                                # lane-dense fused-head output width


def music_gen_kernel(x_ref,                    # (T*B, 8)   time-major packed input, K-padded
                     wih0_ref, b0_ref,         # (8, 4H), (1, 4H)  layer-0 input proj (K-padded) + fused bias
                     whh0_ref,                 # (H, 4H)           layer-0 recurrent weight
                     wih1_ref, whh1_ref, b1_ref,   # (H, 4H), (H, 4H), (1, 4H)
                     wih2_ref, whh2_ref, b2_ref,   # (H, 4H), (H, 4H), (1, 4H)
                     whead_ref, bhead_ref,     # (H, 128), (1, 128) fused + zero-padded heads
                     out_ref):                 # (B, 128)
    TB = x_ref.shape[0]
    H = HIDDEN
    B = out_ref.shape[0]
    T = TB // B

    # ---- hoisted layer-0 input projection for ALL timesteps: one small MXU dot,
    #      kept as a value (no VMEM scratch roundtrip), off the recurrence chain. ----
    g0_all = (jnp.dot(x_ref[...], wih0_ref[...], preferred_element_type=jnp.float32)
              + b0_ref[...])                                    # (T*B, 4H)

    # ---- recurrent / input weights resident as values across the (short) loop ----
    whh0 = whh0_ref[...]
    wih1, whh1, b1 = wih1_ref[...], whh1_ref[...], b1_ref[...]
    wih2, whh2, b2 = wih2_ref[...], whh2_ref[...], b2_ref[...]

    def lstm_cell(gates, c_prev):
        # PyTorch gate order along 4H: i, f, g, o.
        sg = jax.nn.sigmoid(gates)              # one EUP pass over the full (B,4H) gates
        tg = jnp.tanh(gates)                    # one EUP pass over the full (B,4H) gates
        i_g = sg[:, 0 * H:1 * H]
        f_g = sg[:, 1 * H:2 * H]
        g_g = tg[:, 2 * H:3 * H]
        o_g = sg[:, 3 * H:4 * H]
        c_new = f_g * c_prev + i_g * g_g
        h_new = o_g * jnp.tanh(c_new)
        return h_new, c_new

    zeros = jnp.zeros((B, H), jnp.float32)
    h0, h1, h2 = zeros, zeros, zeros            # matches the PyTorch module's zero h0/c0
    c0, c1, c2 = zeros, zeros, zeros

    # ---- wavefront-skewed, fully unrolled recurrence (T static & small) ----
    # Iteration s: layer0 processes timestep s, layer1 timestep s-1, layer2 timestep s-2.
    # Within an iteration the three layer computations read only values committed in
    # earlier iterations, so their MXU / EUP / VPU work is mutually independent.
    for s in range(T + 2):
        do0 = s < T
        do1 = 1 <= s <= T
        do2 = 2 <= s <= T + 1

        # gate matmuls first (independent -> back-to-back MXU pushes)
        if do0:
            gates0 = (g0_all[s * B:(s + 1) * B, :]
                      + jnp.dot(h0, whh0, preferred_element_type=jnp.float32))
        if do1:
            gates1 = (jnp.dot(h0, wih1, preferred_element_type=jnp.float32)
                      + jnp.dot(h1, whh1, preferred_element_type=jnp.float32) + b1)
        if do2:
            gates2 = (jnp.dot(h1, wih2, preferred_element_type=jnp.float32)
                      + jnp.dot(h2, whh2, preferred_element_type=jnp.float32) + b2)

        # cell updates (EUP/VPU), also mutually independent within the iteration
        if do0:
            h0_new, c0 = lstm_cell(gates0, c0)
        if do1:
            h1_new, c1 = lstm_cell(gates1, c1)
        if do2:
            h2_new, c2 = lstm_cell(gates2, c2)

        # commit the skewed state for the next iteration
        if do0:
            h0 = h0_new
        if do1:
            h1 = h1_new
        if do2:
            h2 = h2_new
        # TODO(synk): nn.LSTM inter-layer dropout(0.5) is train-only; eval forward is identity.

    # ---- fused heads: one matmul + one lane-dense (B, 128) store ----
    # (head weights only read here, so they don't hold vregs during the loop)
    out_ref[...] = (jnp.dot(h2, whead_ref[...], preferred_element_type=jnp.float32)
                    + bhead_ref[...])


def music_generator_forward(x, params):
    """x: (B, T, 3) float32 (batch_first, like the PyTorch module)."""
    B, T, _ = x.shape
    # time-major packed layout: (T*B, 3), zero-padded on K to 8 for a clean MXU dot.
    x_tm = jnp.transpose(x, (1, 0, 2)).reshape(T * B, INPUT_SIZE)
    x_pad = jnp.pad(x_tm, ((0, 0), (0, K0_PAD - INPUT_SIZE)))

    # Layer 0: pre-transposed, K-padded input weight; biases fused (b_ih + b_hh).
    w_ih0, w_hh0, b_ih0, b_hh0 = params["lstm_l0"]
    wih0T = jnp.pad(w_ih0.T, ((0, K0_PAD - INPUT_SIZE), (0, 0)))  # (8, 4H)
    b0 = (b_ih0 + b_hh0)[None, :]                                 # (1, 4H)
    whh0T = w_hh0.T                                               # (H, 4H)

    # Layers 1/2: de-fused (separate Wih / Whh) so each cell does two independent
    # K=32 matmuls instead of a lane-concat + one K=64 matmul on the serial chain.
    w_ih1, w_hh1, b_ih1, b_hh1 = params["lstm_l1"]
    w_ih2, w_hh2, b_ih2, b_hh2 = params["lstm_l2"]
    wih1T, whh1T, b1 = w_ih1.T, w_hh1.T, (b_ih1 + b_hh1)[None, :]
    wih2T, whh2T, b2 = w_ih2.T, w_hh2.T, (b_ih2 + b_hh2)[None, :]

    # Fused output heads, zero-padded to 128 lanes for a lane-dense output store.
    Wn, bn = params["notes"]
    Wo, bo = params["offsets"]
    Wd, bd = params["durations"]
    w_heads = jnp.concatenate([Wn.T, Wo.T, Wd.T], axis=1)         # (H, 52)
    b_heads = jnp.concatenate([bn, bo, bd])[None, :]              # (1, 52)
    w_heads = jnp.pad(w_heads, ((0, 0), (0, HEAD_PAD - N_HEADS)))
    b_heads = jnp.pad(b_heads, ((0, 0), (0, HEAD_PAD - N_HEADS)))

    # Grid-less call: the whole problem (a few tens of KiB) lives in VMEM on every
    # generation.  Only add a B-grid (dimension_semantics=("parallel",)) on v7x when
    # B >= 16 so each TensorCore gets >= 8 sublane-dense rows per block.
    out = pl.pallas_call(
        music_gen_kernel,
        out_shape=jax.ShapeDtypeStruct((B, HEAD_PAD), jnp.float32),
        in_specs=[pl.BlockSpec(memory_space=pltpu.MemorySpace.VMEM)] * 12,
        out_specs=pl.BlockSpec(memory_space=pltpu.MemorySpace.VMEM),
    )(x_pad, wih0T, b0, whh0T, wih1T, whh1T, b1, wih2T, whh2T, b2, w_heads, b_heads)

    return (out[:, :N_NOTES],
            out[:, N_NOTES:N_NOTES + N_OFFSETS],
            out[:, N_NOTES + N_OFFSETS:N_HEADS])


def init_params(key):
    """Deterministic synthetic init mimicking PyTorch's U(-1/sqrt(H), 1/sqrt(H))."""
    bound = 1.0 / float(jnp.sqrt(jnp.float32(HIDDEN)))
    keys = jax.random.split(key, 3 * 4 + 3 * 2)
    params = {}
    idx = 0
    for l in range(NUM_LAYERS):
        in_sz = INPUT_SIZE if l == 0 else HIDDEN
        w_ih = jax.random.uniform(keys[idx], (4 * HIDDEN, in_sz), jnp.float32, -bound, bound); idx += 1
        w_hh = jax.random.uniform(keys[idx], (4 * HIDDEN, HIDDEN), jnp.float32, -bound, bound); idx += 1
        b_ih = jax.random.uniform(keys[idx], (4 * HIDDEN,), jnp.float32, -bound, bound); idx += 1
        b_hh = jax.random.uniform(keys[idx], (4 * HIDDEN,), jnp.float32, -bound, bound); idx += 1
        params[f"lstm_l{l}"] = (w_ih, w_hh, b_ih, b_hh)
    for name, n_out in (("notes", N_NOTES), ("offsets", N_OFFSETS), ("durations", N_DURATIONS)):
        W = jax.random.uniform(keys[idx], (n_out, HIDDEN), jnp.float32, -bound, bound); idx += 1
        b = jax.random.uniform(keys[idx], (n_out,), jnp.float32, -bound, bound); idx += 1
        params[name] = (W, b)
    return params


def reference_forward(x, params):
    """Pure-JAX reference matching PyTorch nn.LSTM (eval) + Linear heads."""
    B, T, _ = x.shape
    h = [jnp.zeros((B, HIDDEN), jnp.float32) for _ in range(NUM_LAYERS)]
    c = [jnp.zeros((B, HIDDEN), jnp.float32) for _ in range(NUM_LAYERS)]
    for t in range(T):
        inp = x[:, t, :]
        for l in range(NUM_LAYERS):
            w_ih, w_hh, b_ih, b_hh = params[f"lstm_l{l}"]
            gates = inp @ w_ih.T + h[l] @ w_hh.T + b_ih + b_hh
            i_g = jax.nn.sigmoid(gates[:, :HIDDEN])
            f_g = jax.nn.sigmoid(gates[:, HIDDEN:2 * HIDDEN])
            g_g = jnp.tanh(gates[:, 2 * HIDDEN:3 * HIDDEN])
            o_g = jax.nn.sigmoid(gates[:, 3 * HIDDEN:])
            c[l] = f_g * c[l] + i_g * g_g
            h[l] = o_g * jnp.tanh(c[l])
            inp = h[l]
    out = h[-1]
    Wn, bn = params["notes"]
    Wo, bo = params["offsets"]
    Wd, bd = params["durations"]
    return out @ Wn.T + bn, out @ Wo.T + bo, out @ Wd.T + bd


if __name__ == "__main__":
    key = jax.random.PRNGKey(0)
    k_params, k_x = jax.random.split(key)
    params = init_params(k_params)

    B, T = 2, 8
    x = jax.random.normal(k_x, (B, T, INPUT_SIZE), jnp.float32)

    fwd = jax.jit(music_generator_forward)
    notes, offs, durs = fwd(x, params)
    jax.block_until_ready((notes, offs, durs))

    notes_r, offs_r, durs_r = reference_forward(x, params)
    assert jnp.allclose(notes, notes_r, atol=1e-4), "notes mismatch"
    assert jnp.allclose(offs, offs_r, atol=1e-4), "offsets mismatch"
    assert jnp.allclose(durs, durs_r, atol=1e-4), "durations mismatch"

    print("KERNEL_OK")
</pallas_src>

<mosaic_0001>
module attributes {stable_mosaic.version = 11 : i64} {
  func.func @music_gen_kernel(%arg0: memref<16x8xf32, #tpu.memory_space<vmem>>, %arg1: memref<8x128xf32, #tpu.memory_space<vmem>>, %arg2: memref<1x128xf32, #tpu.memory_space<vmem>>, %arg3: memref<32x128xf32, #tpu.memory_space<vmem>>, %arg4: memref<32x128xf32, #tpu.memory_space<vmem>>, %arg5: memref<32x128xf32, #tpu.memory_space<vmem>>, %arg6: memref<1x128xf32, #tpu.memory_space<vmem>>, %arg7: memref<32x128xf32, #tpu.memory_space<vmem>>, %arg8: memref<32x128xf32, #tpu.memory_space<vmem>>, %arg9: memref<1x128xf32, #tpu.memory_space<vmem>>, %arg10: memref<32x128xf32, #tpu.memory_space<vmem>>, %arg11: memref<1x128xf32, #tpu.memory_space<vmem>>, %arg12: memref<2x128xf32, #tpu.memory_space<vmem>>) attributes {dimension_semantics = [], scalar_prefetch = 0 : i64, scratch_operands = 0 : i64, tpu.core_type = #tpu.core_type<tc>} {
    %c0 = arith.constant 0 : index
    %c0_0 = arith.constant 0 : index
    %0 = vector.load %arg0[%c0, %c0_0] : memref<16x8xf32, #tpu.memory_space<vmem>>, vector<16x8xf32>
    %c0_1 = arith.constant 0 : index
    %c0_2 = arith.constant 0 : index
    %1 = vector.load %arg1[%c0_1, %c0_2] : memref<8x128xf32, #tpu.memory_space<vmem>>, vector<8x128xf32>
    %cst = arith.constant dense<0.000000e+00> : vector<16x128xf32>
    %2 = tpu.matmul %0, %1, %cst {dimension_numbers = #tpu.dot_dimension_numbers<[1], [0], [0], [1], [0, 0, 1, 1], [], []>} : vector<16x8xf32>, vector<8x128xf32>, vector<16x128xf32> -> vector<16x128xf32>
    %c0_3 = arith.constant 0 : index
    %c0_4 = arith.constant 0 : index
    %3 = vector.load %arg2[%c0_3, %c0_4] : memref<1x128xf32, #tpu.memory_space<vmem>>, vector<1x128xf32>
    %4 = vector.broadcast %3 : vector<1x128xf32> to vector<16x128xf32>
    %5 = arith.addf %2, %4 : vector<16x128xf32>
    %c0_5 = arith.constant 0 : index
    %c0_6 = arith.constant 0 : index
    %6 = vector.load %arg3[%c0_5, %c0_6] : memref<32x128xf32, #tpu.memory_space<vmem>>, vector<32x128xf32>
    %c0_7 = arith.constant 0 : index
    %c0_8 = arith.constant 0 : index
    %7 = vector.load %arg4[%c0_7, %c0_8] : memref<32x128xf32, #tpu.memory_space<vmem>>, vector<32x128xf32>
    %c0_9 = arith.constant 0 : index
    %c0_10 = arith.constant 0 : index
    %8 = vector.load %arg5[%c0_9, %c0_10] : memref<32x128xf32, #tpu.memory_space<vmem>>, vector<32x128xf32>
    %c0_11 = arith.constant 0 : index
    %c0_12 = arith.constant 0 : index
    %9 = vector.load %arg6[%c0_11, %c0_12] : memref<1x128xf32, #tpu.memory_space<vmem>>, vector<1x128xf32>
    %c0_13 = arith.constant 0 : index
    %c0_14 = arith.constant 0 : index
    %10 = vector.load %arg7[%c0_13, %c0_14] : memref<32x128xf32, #tpu.memory_space<vmem>>, vector<32x128xf32>
    %c0_15 = arith.constant 0 : index
    %c0_16 = arith.constant 0 : index
    %11 = vector.load %arg8[%c0_15, %c0_16] : memref<32x128xf32, #tpu.memory_space<vmem>>, vector<32x128xf32>
    %c0_17 = arith.constant 0 : index
    %c0_18 = arith.constant 0 : index
    %12 = vector.load %arg9[%c0_17, %c0_18] : memref<1x128xf32, #tpu.memory_space<vmem>>, vector<1x128xf32>
    %cst_19 = arith.constant 0.000000e+00 : f32
    %13 = vector.broadcast %cst_19 : f32 to vector<2x32xf32>
    %14 = vector.extract_strided_slice %5 {offsets = [0, 0], sizes = [2, 128], strides = [1, 1]} : vector<16x128xf32> to vector<2x128xf32>
    %cst_20 = arith.constant dense<0.000000e+00> : vector<2x128xf32>
    %15 = tpu.matmul %13, %6, %cst_20 {dimension_numbers = #tpu.dot_dimension_numbers<[1], [0], [0], [1], [0, 0, 1, 1], [], []>} : vector<2x32xf32>, vector<32x128xf32>, vector<2x128xf32> -> vector<2x128xf32>
    %16 = arith.addf %14, %15 : vector<2x128xf32>
    %17 = arith.negf %16 : vector<2x128xf32>
    %18 = math.exp %17 : vector<2x128xf32>
    %cst_21 = arith.constant 1.000000e+00 : f32
    %19 = vector.broadcast %cst_21 : f32 to vector<2x128xf32>
    %20 = arith.addf %19, %18 : vector<2x128xf32>
    %21 = arith.divf %19, %20 : vector<2x128xf32>
    %22 = math.tanh %16 : vector<2x128xf32>
    %23 = vector.extract_strided_slice %21 {offsets = [0, 0], sizes = [2, 32], strides = [1, 1]} : vector<2x128xf32> to vector<2x32xf32>
    %24 = vector.extract_strided_slice %21 {offsets = [0, 32], sizes = [2, 32], strides = [1, 1]} : vector<2x128xf32> to vector<2x32xf32>
    %25 = vector.extract_strided_slice %22 {offsets = [0, 64], sizes = [2, 32], strides = [1, 1]} : vector<2x128xf32> to vector<2x32xf32>
    %26 = vector.extract_strided_slice %21 {offsets = [0, 96], sizes = [2, 32], strides = [1, 1]} : vector<2x128xf32> to vector<2x32xf32>
    %27 = arith.mulf %24, %13 : vector<2x32xf32>
    %28 = arith.mulf %23, %25 : vector<2x32xf32>
    %29 = arith.addf %27, %28 : vector<2x32xf32>
    %30 = math.tanh %29 : vector<2x32xf32>
    %31 = arith.mulf %26, %30 : vector<2x32xf32>
    %32 = vector.extract_strided_slice %5 {offsets = [2, 0], sizes = [2, 128], strides = [1, 1]} : vector<16x128xf32> to vector<2x128xf32>
    %cst_22 = arith.constant dense<0.000000e+00> : vector<2x128xf32>
    %33 = tpu.matmul %31, %6, %cst_22 {dimension_numbers = #tpu.dot_dimension_numbers<[1], [0], [0], [1], [0, 0, 1, 1], [], []>} : vector<2x32xf32>, vector<32x128xf32>, vector<2x128xf32> -> vector<2x128xf32>
    %34 = arith.addf %32, %33 : vector<2x128xf32>
    %cst_23 = arith.constant dense<0.000000e+00> : vector<2x128xf32>
    %35 = tpu.matmul %31, %7, %cst_23 {dimension_numbers = #tpu.dot_dimension_numbers<[1], [0], [0], [1], [0, 0, 1, 1], [], []>} : vector<2x32xf32>, vector<32x128xf32>, vector<2x128xf32> -> vector<2x128xf32>
    %cst_24 = arith.constant dense<0.000000e+00> : vector<2x128xf32>
    %36 = tpu.matmul %13, %8, %cst_24 {dimension_numbers = #tpu.dot_dimension_numbers<[1], [0], [0], [1], [0, 0, 1, 1], [], []>} : vector<2x32xf32>, vector<32x128xf32>, vector<2x128xf32> -> vector<2x128xf32>
    %37 = arith.addf %35, %36 : vector<2x128xf32>
    %38 = vector.broadcast %9 : vector<1x128xf32> to vector<2x128xf32>
    %39 = arith.addf %37, %38 : vector<2x128xf32>
    %40 = arith.negf %34 : vector<2x128xf32>
    %41 = math.exp %40 : vector<2x128xf32>
    %cst_25 = arith.constant 1.000000e+00 : f32
    %42 = vector.broadcast %cst_25 : f32 to vector<2x128xf32>
    %43 = arith.addf %42, %41 : vector<2x128xf32>
    %44 = arith.divf %42, %43 : vector<2x128xf32>
    %45 = math.tanh %34 : vector<2x128xf32>
    %46 = vector.extract_strided_slice %44 {offsets = [0, 0], sizes = [2, 32], strides = [1, 1]} : vector<2x128xf32> to vector<2x32xf32>
    %47 = vector.extract_strided_slice %44 {offsets = [0, 32], sizes = [2, 32], strides = [1, 1]} : vector<2x128xf32> to vector<2x32xf32>
    %48 = vector.extract_strided_slice %45 {offsets = [0, 64], sizes = [2, 32], strides = [1, 1]} : vector<2x128xf32> to vector<2x32xf32>
    %49 = vector.extract_strided_slice %44 {offsets = [0, 96], sizes = [2, 32], strides = [1, 1]} : vector<2x128xf32> to vector<2x32xf32>
    %50 = arith.mulf %47, %29 : vector<2x32xf32>
    %51 = arith.mulf %46, %48 : vector<2x32xf32>
    %52 = arith.addf %50, %51 : vector<2x32xf32>
    %53 = math.tanh %52 : vector<2x32xf32>
    %54 = arith.mulf %49, %53 : vector<2x32xf32>
    %55 = arith.negf %39 : vector<2x128xf32>
    %56 = math.exp %55 : vector<2x128xf32>
    %cst_26 = arith.constant 1.000000e+00 : f32
    %57 = vector.broadcast %cst_26 : f32 to vector<2x128xf32>
    %58 = arith.addf %57, %56 : vector<2x128xf32>
    %59 = arith.divf %57, %58 : vector<2x128xf32>
    %60 = math.tanh %39 : vector<2x128xf32>
    %61 = vector.extract_strided_slice %59 {offsets = [0, 0], sizes = [2, 32], strides = [1, 1]} : vector<2x128xf32> to vector<2x32xf32>
    %62 = vector.extract_strided_slice %59 {offsets = [0, 32], sizes = [2, 32], strides = [1, 1]} : vector<2x128xf32> to vector<2x32xf32>
    %63 = vector.extract_strided_slice %60 {offsets = [0, 64], sizes = [2, 32], strides = [1, 1]} : vector<2x128xf32> to vector<2x32xf32>
    %64 = vector.extract_strided_slice %59 {offsets = [0, 96], sizes = [2, 32], strides = [1, 1]} : vector<2x128xf32> to vector<2x32xf32>
    %65 = arith.mulf %62, %13 : vector<2x32xf32>
    %66 = arith.mulf %61, %63 : vector<2x32xf32>
    %67 = arith.addf %65, %66 : vector<2x32xf32>
    %68 = math.tanh %67 : vector<2x32xf32>
    %69 = arith.mulf %64, %68 : vector<2x32xf32>
    %70 = vector.extract_strided_slice %5 {offsets = [4, 0], sizes = [2, 128], strides = [1, 1]} : vector<16x128xf32> to vector<2x128xf32>
    %cst_27 = arith.constant dense<0.000000e+00> : vector<2x128xf32>
    %71 = tpu.matmul %54, %6, %cst_27 {dimension_numbers = #tpu.dot_dimension_numbers<[1], [0], [0], [1], [0, 0, 1, 1], [], []>} : vector<2x32xf32>, vector<32x128xf32>, vector<2x128xf32> -> vector<2x128xf32>
    %72 = arith.addf %70, %71 : vector<2x128xf32>
    %cst_28 = arith.constant dense<0.000000e+00> : vector<2x128xf32>
    %73 = tpu.matmul %54, %7, %cst_28 {dimension_numbers = #tpu.dot_dimension_numbers<[1], [0], [0], [1], [0, 0, 1, 1], [], []>} : vector<2x32xf32>, vector<32x128xf32>, vector<2x128xf32> -> vector<2x128xf32>
    %cst_29 = arith.constant dense<0.000000e+00> : vector<2x128xf32>
    %74 = tpu.matmul %69, %8, %cst_29 {dimension_numbers = #tpu.dot_dimension_numbers<[1], [0], [0], [1], [0, 0, 1, 1], [], []>} : vector<2x32xf32>, vector<32x128xf32>, vector<2x128xf32> -> vector<2x128xf32>
    %75 = arith.addf %73, %74 : vector<2x128xf32>
    %76 = vector.broadcast %9 : vector<1x128xf32> to vector<2x128xf32>
    %77 = arith.addf %75, %76 : vector<2x128xf32>
    %cst_30 = arith.constant dense<0.000000e+00> : vector<2x128xf32>
    %78 = tpu.matmul %69, %10, %cst_30 {dimension_numbers = #tpu.dot_dimension_numbers<[1], [0], [0], [1], [0, 0, 1, 1], [], []>} : vector<2x32xf32>, vector<32x128xf32>, vector<2x128xf32> -> vector<2x128xf32>
    %cst_31 = arith.constant dense<0.000000e+00> : vector<2x128xf32>
    %79 = tpu.matmul %13, %11, %cst_31 {dimension_numbers = #tpu.dot_dimension_numbers<[1], [0], [0], [1], [0, 0, 1, 1], [], []>} : vector<2x32xf32>, vector<32x128xf32>, vector<2x128xf32> -> vector<2x128xf32>
    %80 = arith.addf %78, %79 : vector<2x128xf32>
    %81 = vector.broadcast %12 : vector<1x128xf32> to vector<2x128xf32>
    %82 = arith.addf %80, %81 : vector<2x128xf32>
    %83 = arith.negf %72 : vector<2x128xf32>
    %84 = math.exp %83 : vector<2x128xf32>
    %cst_32 = arith.constant 1.000000e+00 : f32
    %85 = vector.broadcast %cst_32 : f32 to vector<2x128xf32>
    %86 = arith.addf %85, %84 : vector<2x128xf32>
    %87 = arith.divf %85, %86 : vector<2x128xf32>
    %88 = math.tanh %72 : vector<2x128xf32>
    %89 = vector.extract_strided_slice %87 {offsets = [0, 0], sizes = [2, 32], strides = [1, 1]} : vector<2x128xf32> to vector<2x32xf32>
    %90 = vector.extract_strided_slice %87 {offsets = [0, 32], sizes = [2, 32], strides = [1, 1]} : vector<2x128xf32> to vector<2x32xf32>
    %91 = vector.extract_strided_slice %88 {offsets = [0, 64], sizes = [2, 32], strides = [1, 1]} : vector<2x128xf32> to vector<2x32xf32>
    %92 = vector.extract_strided_slice %87 {offsets = [0, 96], sizes = [2, 32], strides = [1, 1]} : vector<2x128xf32> to vector<2x32xf32>
    %93 = arith.mulf %90, %52 : vector<2x32xf32>
    %94 = arith.mulf %89, %91 : vector<2x32xf32>
    %95 = arith.addf %93, %94 : vector<2x32xf32>
    %96 = math.tanh %95 : vector<2x32xf32>
    %97 = arith.mulf %92, %96 : vector<2x32xf32>
    %98 = arith.negf %77 : vector<2x128xf32>
    %99 = math.exp %98 : vector<2x128xf32>
    %cst_33 = arith.constant 1.000000e+00 : f32
    %100 = vector.broadcast %cst_33 : f32 to vector<2x128xf32>
    %101 = arith.addf %100, %99 : vector<2x128xf32>
    %102 = arith.divf %100, %101 : vector<2x128xf32>
    %103 = math.tanh %77 : vector<2x128xf32>
    %104 = vector.extract_strided_slice %102 {offsets = [0, 0], sizes = [2, 32], strides = [1, 1]} : vector<2x128xf32> to vector<2x32xf32>
    %105 = vector.extract_strided_slice %102 {offsets = [0, 32], sizes = [2, 32], strides = [1, 1]} : vector<2x128xf32> to vector<2x32xf32>
    %106 = vector.extract_strided_slice %103 {offsets = [0, 64], sizes = [2, 32], strides = [1, 1]} : vector<2x128xf32> to vector<2x32xf32>
    %107 = vector.extract_strided_slice %102 {offsets = [0, 96], sizes = [2, 32], strides = [1, 1]} : vector<2x128xf32> to vector<2x32xf32>
    %108 = arith.mulf %105, %67 : vector<2x32xf32>
    %109 = arith.mulf %104, %106 : vector<2x32xf32>
    %110 = arith.addf %108, %109 : vector<2x32xf32>
    %111 = math.tanh %110 : vector<2x32xf32>
    %112 = arith.mulf %107, %111 : vector<2x32xf32>
    %113 = arith.negf %82 : vector<2x128xf32>
    %114 = math.exp %113 : vector<2x128xf32>
    %cst_34 = arith.constant 1.000000e+00 : f32
    %115 = vector.broadcast %cst_34 : f32 to vector<2x128xf32>
    %116 = arith.addf %115, %114 : vector<2x128xf32>
    %117 = arith.divf %115, %116 : vector<2x128xf32>
    %118 = math.tanh %82 : vector<2x128xf32>
    %119 = vector.extract_strided_slice %117 {offsets = [0, 0], sizes = [2, 32], strides = [1, 1]} : vector<2x128xf32> to vector<2x32xf32>
    %120 = vector.extract_strided_slice %117 {offsets = [0, 32], sizes = [2, 32], strides = [1, 1]} : vector<2x128xf32> to vector<2x32xf32>
    %121 = vector.extract_strided_slice %118 {offsets = [0, 64], sizes = [2, 32], strides = [1, 1]} : vector<2x128xf32> to vector<2x32xf32>
    %122 = vector.extract_strided_slice %117 {offsets = [0, 96], sizes = [2, 32], strides = [1, 1]} : vector<2x128xf32> to vector<2x32xf32>
    %123 = arith.mulf %120, %13 : vector<2x32xf32>
    %124 = arith.mulf %119, %121 : vector<2x32xf32>
    %125 = arith.addf %123, %124 : vector<2x32xf32>
    %126 = math.tanh %125 : vector<2x32xf32>
    %127 = arith.mulf %122, %126 : vector<2x32xf32>
    %128 = vector.extract_strided_slice %5 {offsets = [6, 0], sizes = [2, 128], strides = [1, 1]} : vector<16x128xf32> to vector<2x128xf32>
    %cst_35 = arith.constant dense<0.000000e+00> : vector<2x128xf32>
    %129 = tpu.matmul %97, %6, %cst_35 {dimension_numbers = #tpu.dot_dimension_numbers<[1], [0], [0], [1], [0, 0, 1, 1], [], []>} : vector<2x32xf32>, vector<32x128xf32>, vector<2x128xf32> -> vector<2x128xf32>
    %130 = arith.addf %128, %129 : vector<2x128xf32>
    %cst_36 = arith.constant dense<0.000000e+00> : vector<2x128xf32>
    %131 = tpu.matmul %97, %7, %cst_36 {dimension_numbers = #tpu.dot_dimension_numbers<[1], [0], [0], [1], [0, 0, 1, 1], [], []>} : vector<2x32xf32>, vector<32x128xf32>, vector<2x128xf32> -> vector<2x128xf32>
    %cst_37 = arith.constant dense<0.000000e+00> : vector<2x128xf32>
    %132 = tpu.matmul %112, %8, %cst_37 {dimension_numbers = #tpu.dot_dimension_numbers<[1], [0], [0], [1], [0, 0, 1, 1], [], []>} : vector<2x32xf32>, vector<32x128xf32>, vector<2x128xf32> -> vector<2x128xf32>
    %133 = arith.addf %131, %132 : vector<2x128xf32>
    %134 = vector.broadcast %9 : vector<1x128xf32> to vector<2x128xf32>
    %135 = arith.addf %133, %134 : vector<2x128xf32>
    %cst_38 = arith.constant dense<0.000000e+00> : vector<2x128xf32>
    %136 = tpu.matmul %112, %10, %cst_38 {dimension_numbers = #tpu.dot_dimension_numbers<[1], [0], [0], [1], [0, 0, 1, 1], [], []>} : vector<2x32xf32>, vector<32x128xf32>, vector<2x128xf32> -> vector<2x128xf32>
    %cst_39 = arith.constant dense<0.000000e+00> : vector<2x128xf32>
    %137 = tpu.matmul %127, %11, %cst_39 {dimension_numbers = #tpu.dot_dimension_numbers<[1], [0], [0], [1], [0, 0, 1, 1], [], []>} : vector<2x32xf32>, vector<32x128xf32>, vector<2x128xf32> -> vector<2x128xf32>
    %138 = arith.addf %136, %137 : vector<2x128xf32>
    %139 = vector.broadcast %12 : vector<1x128xf32> to vector<2x128xf32>
    %140 = arith.addf %138, %139 : vector<2x128xf32>
    %141 = arith.negf %130 : vector<2x128xf32>
    %142 = math.exp %141 : vector<2x128xf32>
    %cst_40 = arith.constant 1.000000e+00 : f32
    %143 = vector.broadcast %cst_40 : f32 to vector<2x128xf32>
    %144 = arith.addf %143, %142 : vector<2x128xf32>
    %145 = arith.divf %143, %144 : vector<2x128xf32>
    %146 = math.tanh %130 : vector<2x128xf32>
    %147 = vector.extract_strided_slice %145 {offsets = [0, 0], sizes = [2, 32], strides = [1, 1]} : vector<2x128xf32> to vector<2x32xf32>
    %148 = vector.extract_strided_slice %145 {offsets = [0, 32], sizes = [2, 32], strides = [1, 1]} : vector<2x128xf32> to vector<2x32xf32>
    %149 = vector.extract_strided_slice %146 {offsets = [0, 64], sizes = [2, 32], strides = [1, 1]} : vector<2x128xf32> to vector<2x32xf32>
    %150 = vector.extract_strided_slice %145 {offsets = [0, 96], sizes = [2, 32], strides = [1, 1]} : vector<2x128xf32> to vector<2x32xf32>
    %151 = arith.mulf %148, %95 : vector<2x32xf32>
    %152 = arith.mulf %147, %149 : vector<2x32xf32>
    %153 = arith.addf %151, %152 : vector<2x32xf32>
    %154 = math.tanh %153 : vector<2x32xf32>
    %155 = arith.mulf %150, %154 : vector<2x32xf32>
    %156 = arith.negf %135 : vector<2x128xf32>
    %157 = math.exp %156 : vector<2x128xf32>
    %cst_41 = arith.constant 1.000000e+00 : f32
    %158 = vector.broadcast %cst_41 : f32 to vector<2x128xf32>
    %159 = arith.addf %158, %157 : vector<2x128xf32>
    %160 = arith.divf %158, %159 : vector<2x128xf32>
    %161 = math.tanh %135 : vector<2x128xf32>
    %162 = vector.extract_strided_slice %160 {offsets = [0, 0], sizes = [2, 32], strides = [1, 1]} : vector<2x128xf32> to vector<2x32xf32>
    %163 = vector.extract_strided_slice %160 {offsets = [0, 32], sizes = [2, 32], strides = [1, 1]} : vector<2x128xf32> to vector<2x32xf32>
    %164 = vector.extract_strided_slice %161 {offsets = [0, 64], sizes = [2, 32], strides = [1, 1]} : vector<2x128xf32> to vector<2x32xf32>
    %165 = vector.extract_strided_slice %160 {offsets = [0, 96], sizes = [2, 32], strides = [1, 1]} : vector<2x128xf32> to vector<2x32xf32>
    %166 = arith.mulf %163, %110 : vector<2x32xf32>
    %167 = arith.mulf %162, %164 : vector<2x32xf32>
    %168 = arith.addf %166, %167 : vector<2x32xf32>
    %169 = math.tanh %168 : vector<2x32xf32>
    %170 = arith.mulf %165, %169 : vector<2x32xf32>
    %171 = arith.negf %140 : vector<2x128xf32>
    %172 = math.exp %171 : vector<2x128xf32>
    %cst_42 = arith.constant 1.000000e+00 : f32
    %173 = vector.broadcast %cst_42 : f32 to vector<2x128xf32>
    %174 = arith.addf %173, %172 : vector<2x128xf32>
    %175 = arith.divf %173, %174 : vector<2x128xf32>
    %176 = math.tanh %140 : vector<2x128xf32>
    %177 = vector.extract_strided_slice %175 {offsets = [0, 0], sizes = [2, 32], strides = [1, 1]} : vector<2x128xf32> to vector<2x32xf32>
    %178 = vector.extract_strided_slice %175 {offsets = [0, 32], sizes = [2, 32], strides = [1, 1]} : vector<2x128xf32> to vector<2x32xf32>
    %179 = vector.extract_strided_slice %176 {offsets = [0, 64], sizes = [2, 32], strides = [1, 1]} : vector<2x128xf32> to vector<2x32xf32>
    %180 = vector.extract_strided_slice %175 {offsets = [0, 96], sizes = [2, 32], strides = [1, 1]} : vector<2x128xf32> to vector<2x32xf32>
    %181 = arith.mulf %178, %125 : vector<2x32xf32>
    %182 = arith.mulf %177, %179 : vector<2x32xf32>
    %183 = arith.addf %181, %182 : vector<2x32xf32>
    %184 = math.tanh %183 : vector<2x32xf32>
    %185 = arith.mulf %180, %184 : vector<2x32xf32>
    %186 = vector.extract_strided_slice %5 {offsets = [8, 0], sizes = [2, 128], strides = [1, 1]} : vector<16x128xf32> to vector<2x128xf32>
    %cst_43 = arith.constant dense<0.000000e+00> : vector<2x128xf32>
    %187 = tpu.matmul %155, %6, %cst_43 {dimension_numbers = #tpu.dot_dimension_numbers<[1], [0], [0], [1], [0, 0, 1, 1], [], []>} : vector<2x32xf32>, vector<32x128xf32>, vector<2x128xf32> -> vector<2x128xf32>
    %188 = arith.addf %186, %187 : vector<2x128xf32>
    %cst_44 = arith.constant dense<0.000000e+00> : vector<2x128xf32>
    %189 = tpu.matmul %155, %7, %cst_44 {dimension_numbers = #tpu.dot_dimension_numbers<[1], [0], [0], [1], [0, 0, 1, 1], [], []>} : vector<2x32xf32>, vector<32x128xf32>, vector<2x128xf32> -> vector<2x128xf32>
    %cst_45 = arith.constant dense<0.000000e+00> : vector<2x128xf32>
    %190 = tpu.matmul %170, %8, %cst_45 {dimension_numbers = #tpu.dot_dimension_numbers<[1], [0], [0], [1], [0, 0, 1, 1], [], []>} : vector<2x32xf32>, vector<32x128xf32>, vector<2x128xf32> -> vector<2x128xf32>
    %191 = arith.addf %189, %190 : vector<2x128xf32>
    %192 = vector.broadcast %9 : vector<1x128xf32> to vector<2x128xf32>
    %193 = arith.addf %191, %192 : vector<2x128xf32>
    %cst_46 = arith.constant dense<0.000000e+00> : vector<2x128xf32>
    %194 = tpu.matmul %170, %10, %cst_46 {dimension_numbers = #tpu.dot_dimension_numbers<[1], [0], [0], [1], [0, 0, 1, 1], [], []>} : vector<2x32xf32>, vector<32x128xf32>, vector<2x128xf32> -> vector<2x128xf32>
    %cst_47 = arith.constant dense<0.000000e+00> : vector<2x128xf32>
    %195 = tpu.matmul %185, %11, %cst_47 {dimension_numbers = #tpu.dot_dimension_numbers<[1], [0], [0], [1], [0, 0, 1, 1], [], []>} : vector<2x32xf32>, vector<32x128xf32>, vector<2x128xf32> -> vector<2x128xf32>
    %196 = arith.addf %194, %195 : vector<2x128xf32>
    %197 = vector.broadcast %12 : vector<1x128xf32> to vector<2x128xf32>
    %198 = arith.addf %196, %197 : vector<2x128xf32>
    %199 = arith.negf %188 : vector<2x128xf32>
    %200 = math.exp %199 : vector<2x128xf32>
    %cst_48 = arith.constant 1.000000e+00 : f32
    %201 = vector.broadcast %cst_48 : f32 to vector<2x128xf32>
    %202 = arith.addf %201, %200 : vector<2x128xf32>
    %203 = arith.divf %201, %202 : vector<2x128xf32>
    %204 = math.tanh %188 : vector<2x128xf32>
    %205 = vector.extract_strided_slice %203 {offsets = [0, 0], sizes = [2, 32], strides = [1, 1]} : vector<2x128xf32> to vector<2x32xf32>
    %206 = vector.extract_strided_slice %203 {offsets = [0, 32], sizes = [2, 32], strides = [1, 1]} : vector<2x128xf32> to vector<2x32xf32>
    %207 = vector.extract_strided_slice %204 {offsets = [0, 64], sizes = [2, 32], strides = [1, 1]} : vector<2x128xf32> to vector<2x32xf32>
    %208 = vector.extract_strided_slice %203 {offsets = [0, 96], sizes = [2, 32], strides = [1, 1]} : vector<2x128xf32> to vector<2x32xf32>
    %209 = arith.mulf %206, %153 : vector<2x32xf32>
    %210 = arith.mulf %205, %207 : vector<2x32xf32>
    %211 = arith.addf %209, %210 : vector<2x32xf32>
    %212 = math.tanh %211 : vector<2x32xf32>
    %213 = arith.mulf %208, %212 : vector<2x32xf32>
    %214 = arith.negf %193 : vector<2x128xf32>
    %215 = math.exp %214 : vector<2x128xf32>
    %cst_49 = arith.constant 1.000000e+00 : f32
    %216 = vector.broadcast %cst_49 : f32 to vector<2x128xf32>
    %217 = arith.addf %216, %215 : vector<2x128xf32>
    %218 = arith.divf %216, %217 : vector<2x128xf32>
    %219 = math.tanh %193 : vector<2x128xf32>
    %220 = vector.extract_strided_slice %218 {offsets = [0, 0], sizes = [2, 32], strides = [1, 1]} : vector<2x128xf32> to vector<2x32xf32>
    %221 = vector.extract_strided_slice %218 {offsets = [0, 32], sizes = [2, 32], strides = [1, 1]} : vector<2x128xf32> to vector<2x32xf32>
    %222 = vector.extract_strided_slice %219 {offsets = [0, 64], sizes = [2, 32], strides = [1, 1]} : vector<2x128xf32> to vector<2x32xf32>
    %223 = vector.extract_strided_slice %218 {offsets = [0, 96], sizes = [2, 32], strides = [1, 1]} : vector<2x128xf32> to vector<2x32xf32>
    %224 = arith.mulf %221, %168 : vector<2x32xf32>
    %225 = arith.mulf %220, %222 : vector<2x32xf32>
    %226 = arith.addf %224, %225 : vector<2x32xf32>
    %227 = math.tanh %226 : vector<2x32xf32>
    %228 = arith.mulf %223, %227 : vector<2x32xf32>
    %229 = arith.negf %198 : vector<2x128xf32>
    %230 = math.exp %229 : vector<2x128xf32>
    %cst_50 = arith.constant 1.000000e+00 : f32
    %231 = vector.broadcast %cst_50 : f32 to vector<2x128xf32>
    %232 = arith.addf %231, %230 : vector<2x128xf32>
    %233 = arith.divf %231, %232 : vector<2x128xf32>
    %234 = math.tanh %198 : vector<2x128xf32>
    %235 = vector.extract_strided_slice %233 {offsets = [0, 0], sizes = [2, 32], strides = [1, 1]} : vector<2x128xf32> to vector<2x32xf32>
    %236 = vector.extract_strided_slice %233 {offsets = [0, 32], sizes = [2, 32], strides = [1, 1]} : vector<2x128xf32> to vector<2x32xf32>
    %237 = vector.extract_strided_slice %234 {offsets = [0, 64], sizes = [2, 32], strides = [1, 1]} : vector<2x128xf32> to vector<2x32xf32>
    %238 = vector.extract_strided_slice %233 {offsets = [0, 96], sizes = [2, 32], strides = [1, 1]} : vector<2x128xf32> to vector<2x32xf32>
    %239 = arith.mulf %236, %183 : vector<2x32xf32>
    %240 = arith.mulf %235, %237 : vector<2x32xf32>
    %241 = arith.addf %239, %240 : vector<2x32xf32>
    %242 = math.tanh %241 : vector<2x32xf32>
    %243 = arith.mulf %238, %242 : vector<2x32xf32>
    %244 = vector.extract_strided_slice %5 {offsets = [10, 0], sizes = [2, 128], strides = [1, 1]} : vector<16x128xf32> to vector<2x128xf32>
    %cst_51 = arith.constant dense<0.000000e+00> : vector<2x128xf32>
    %245 = tpu.matmul %213, %6, %cst_51 {dimension_numbers = #tpu.dot_dimension_numbers<[1], [0], [0], [1], [0, 0, 1, 1], [], []>} : vector<2x32xf32>, vector<32x128xf32>, vector<2x128xf32> -> vector<2x128xf32>
    %246 = arith.addf %244, %245 : vector<2x128xf32>
    %cst_52 = arith.constant dense<0.000000e+00> : vector<2x128xf32>
    %247 = tpu.matmul %213, %7, %cst_52 {dimension_numbers = #tpu.dot_dimension_numbers<[1], [0], [0], [1], [0, 0, 1, 1], [], []>} : vector<2x32xf32>, vector<32x128xf32>, vector<2x128xf32> -> vector<2x128xf32>
    %cst_53 = arith.constant dense<0.000000e+00> : vector<2x128xf32>
    %248 = tpu.matmul %228, %8, %cst_53 {dimension_numbers = #tpu.dot_dimension_numbers<[1], [0], [0], [1], [0, 0, 1, 1], [], []>} : vector<2x32xf32>, vector<32x128xf32>, vector<2x128xf32> -> vector<2x128xf32>
    %249 = arith.addf %247, %248 : vector<2x128xf32>
    %250 = vector.broadcast %9 : vector<1x128xf32> to vector<2x128xf32>
    %251 = arith.addf %249, %250 : vector<2x128xf32>
    %cst_54 = arith.constant dense<0.000000e+00> : vector<2x128xf32>
    %252 = tpu.matmul %228, %10, %cst_54 {dimension_numbers = #tpu.dot_dimension_numbers<[1], [0], [0], [1], [0, 0, 1, 1], [], []>} : vector<2x32xf32>, vector<32x128xf32>, vector<2x128xf32> -> vector<2x128xf32>
    %cst_55 = arith.constant dense<0.000000e+00> : vector<2x128xf32>
    %253 = tpu.matmul %243, %11, %cst_55 {dimension_numbers = #tpu.dot_dimension_numbers<[1], [0], [0], [1], [0, 0, 1, 1], [], []>} : vector<2x32xf32>, vector<32x128xf32>, vector<2x128xf32> -> vector<2x128xf32>
    %254 = arith.addf %252, %253 : vector<2x128xf32>
    %255 = vector.broadcast %12 : vector<1x128xf32> to vector<2x128xf32>
    %256 = arith.addf %254, %255 : vector<2x128xf32>
    %257 = arith.negf %246 : vector<2x128xf32>
    %258 = math.exp %257 : vector<2x128xf32>
    %cst_56 = arith.constant 1.000000e+00 : f32
    %259 = vector.broadcast %cst_56 : f32 to vector<2x128xf32>
    %260 = arith.addf %259, %258 : vector<2x128xf32>
    %261 = arith.divf %259, %260 : vector<2x128xf32>
    %262 = math.tanh %246 : vector<2x128xf32>
    %263 = vector.extract_strided_slice %261 {offsets = [0, 0], sizes = [2, 32], strides = [1, 1]} : vector<2x128xf32> to vector<2x32xf32>
    %264 = vector.extract_strided_slice %261 {offsets = [0, 32], sizes = [2, 32], strides = [1, 1]} : vector<2x128xf32> to vector<2x32xf32>
    %265 = vector.extract_strided_slice %262 {offsets = [0, 64], sizes = [2, 32], strides = [1, 1]} : vector<2x128xf32> to vector<2x32xf32>
    %266 = vector.extract_strided_slice %261 {offsets = [0, 96], sizes = [2, 32], strides = [1, 1]} : vector<2x128xf32> to vector<2x32xf32>
    %267 = arith.mulf %264, %211 : vector<2x32xf32>
    %268 = arith.mulf %263, %265 : vector<2x32xf32>
    %269 = arith.addf %267, %268 : vector<2x32xf32>
    %270 = math.tanh %269 : vector<2x32xf32>
    %271 = arith.mulf %266, %270 : vector<2x32xf32>
    %272 = arith.negf %251 : vector<2x128xf32>
    %273 = math.exp %272 : vector<2x128xf32>
    %cst_57 = arith.constant 1.000000e+00 : f32
    %274 = vector.broadcast %cst_57 : f32 to vector<2x128xf32>
    %275 = arith.addf %274, %273 : vector<2x128xf32>
    %276 = arith.divf %274, %275 : vector<2x128xf32>
    %277 = math.tanh %251 : vector<2x128xf32>
    %278 = vector.extract_strided_slice %276 {offsets = [0, 0], sizes = [2, 32], strides = [1, 1]} : vector<2x128xf32> to vector<2x32xf32>
    %279 = vector.extract_strided_slice %276 {offsets = [0, 32], sizes = [2, 32], strides = [1, 1]} : vector<2x128xf32> to vector<2x32xf32>
    %280 = vector.extract_strided_slice %277 {offsets = [0, 64], sizes = [2, 32], strides = [1, 1]} : vector<2x128xf32> to vector<2x32xf32>
    %281 = vector.extract_strided_slice %276 {offsets = [0, 96], sizes = [2, 32], strides = [1, 1]} : vector<2x128xf32> to vector<2x32xf32>
    %282 = arith.mulf %279, %226 : vector<2x32xf32>
    %283 = arith.mulf %278, %280 : vector<2x32xf32>
    %284 = arith.addf %282, %283 : vector<2x32xf32>
    %285 = math.tanh %284 : vector<2x32xf32>
    %286 = arith.mulf %281, %285 : vector<2x32xf32>
    %287 = arith.negf %256 : vector<2x128xf32>
    %288 = math.exp %287 : vector<2x128xf32>
    %cst_58 = arith.constant 1.000000e+00 : f32
    %289 = vector.broadcast %cst_58 : f32 to vector<2x128xf32>
    %290 = arith.addf %289, %288 : vector<2x128xf32>
    %291 = arith.divf %289, %290 : vector<2x128xf32>
    %292 = math.tanh %256 : vector<2x128xf32>
    %293 = vector.extract_strided_slice %291 {offsets = [0, 0], sizes = [2, 32], strides = [1, 1]} : vector<2x128xf32> to vector<2x32xf32>
    %294 = vector.extract_strided_slice %291 {offsets = [0, 32], sizes = [2, 32], strides = [1, 1]} : vector<2x128xf32> to vector<2x32xf32>
    %295 = vector.extract_strided_slice %292 {offsets = [0, 64], sizes = [2, 32], strides = [1, 1]} : vector<2x128xf32> to vector<2x32xf32>
    %296 = vector.extract_strided_slice %291 {offsets = [0, 96], sizes = [2, 32], strides = [1, 1]} : vector<2x128xf32> to vector<2x32xf32>
    %297 = arith.mulf %294, %241 : vector<2x32xf32>
    %298 = arith.mulf %293, %295 : vector<2x32xf32>
    %299 = arith.addf %297, %298 : vector<2x32xf32>
    %300 = math.tanh %299 : vector<2x32xf32>
    %301 = arith.mulf %296, %300 : vector<2x32xf32>
    %302 = vector.extract_strided_slice %5 {offsets = [12, 0], sizes = [2, 128], strides = [1, 1]} : vector<16x128xf32> to vector<2x128xf32>
    %cst_59 = arith.constant dense<0.000000e+00> : vector<2x128xf32>
    %303 = tpu.matmul %271, %6, %cst_59 {dimension_numbers = #tpu.dot_dimension_numbers<[1], [0], [0], [1], [0, 0, 1, 1], [], []>} : vector<2x32xf32>, vector<32x128xf32>, vector<2x128xf32> -> vector<2x128xf32>
    %304 = arith.addf %302, %303 : vector<2x128xf32>
    %cst_60 = arith.constant dense<0.000000e+00> : vector<2x128xf32>
    %305 = tpu.matmul %271, %7, %cst_60 {dimension_numbers = #tpu.dot_dimension_numbers<[1], [0], [0], [1], [0, 0, 1, 1], [], []>} : vector<2x32xf32>, vector<32x128xf32>, vector<2x128xf32> -> vector<2x128xf32>
    %cst_61 = arith.constant dense<0.000000e+00> : vector<2x128xf32>
    %306 = tpu.matmul %286, %8, %cst_61 {dimension_numbers = #tpu.dot_dimension_numbers<[1], [0], [0], [1], [0, 0, 1, 1], [], []>} : vector<2x32xf32>, vector<32x128xf32>, vector<2x128xf32> -> vector<2x128xf32>
    %307 = arith.addf %305, %306 : vector<2x128xf32>
    %308 = vector.broadcast %9 : vector<1x128xf32> to vector<2x128xf32>
    %309 = arith.addf %307, %308 : vector<2x128xf32>
    %cst_62 = arith.constant dense<0.000000e+00> : vector<2x128xf32>
    %310 = tpu.matmul %286, %10, %cst_62 {dimension_numbers = #tpu.dot_dimension_numbers<[1], [0], [0], [1], [0, 0, 1, 1], [], []>} : vector<2x32xf32>, vector<32x128xf32>, vector<2x128xf32> -> vector<2x128xf32>
    %cst_63 = arith.constant dense<0.000000e+00> : vector<2x128xf32>
    %311 = tpu.matmul %301, %11, %cst_63 {dimension_numbers = #tpu.dot_dimension_numbers<[1], [0], [0], [1], [0, 0, 1, 1], [], []>} : vector<2x32xf32>, vector<32x128xf32>, vector<2x128xf32> -> vector<2x128xf32>
    %312 = arith.addf %310, %311 : vector<2x128xf32>
    %313 = vector.broadcast %12 : vector<1x128xf32> to vector<2x128xf32>
    %314 = arith.addf %312, %313 : vector<2x128xf32>
    %315 = arith.negf %304 : vector<2x128xf32>
    %316 = math.exp %315 : vector<2x128xf32>
    %cst_64 = arith.constant 1.000000e+00 : f32
    %317 = vector.broadcast %cst_64 : f32 to vector<2x128xf32>
    %318 = arith.addf %317, %316 : vector<2x128xf32>
    %319 = arith.divf %317, %318 : vector<2x128xf32>
    %320 = math.tanh %304 : vector<2x128xf32>
    %321 = vector.extract_strided_slice %319 {offsets = [0, 0], sizes = [2, 32], strides = [1, 1]} : vector<2x128xf32> to vector<2x32xf32>
    %322 = vector.extract_strided_slice %319 {offsets = [0, 32], sizes = [2, 32], strides = [1, 1]} : vector<2x128xf32> to vector<2x32xf32>
    %323 = vector.extract_strided_slice %320 {offsets = [0, 64], sizes = [2, 32], strides = [1, 1]} : vector<2x128xf32> to vector<2x32xf32>
    %324 = vector.extract_strided_slice %319 {offsets = [0, 96], sizes = [2, 32], strides = [1, 1]} : vector<2x128xf32> to vector<2x32xf32>
    %325 = arith.mulf %322, %269 : vector<2x32xf32>
    %326 = arith.mulf %321, %323 : vector<2x32xf32>
    %327 = arith.addf %325, %326 : vector<2x32xf32>
    %328 = math.tanh %327 : vector<2x32xf32>
    %329 = arith.mulf %324, %328 : vector<2x32xf32>
    %330 = arith.negf %309 : vector<2x128xf32>
    %331 = math.exp %330 : vector<2x128xf32>
    %cst_65 = arith.constant 1.000000e+00 : f32
    %332 = vector.broadcast %cst_65 : f32 to vector<2x128xf32>
    %333 = arith.addf %332, %331 : vector<2x128xf32>
    %334 = arith.divf %332, %333 : vector<2x128xf32>
    %335 = math.tanh %309 : vector<2x128xf32>
    %336 = vector.extract_strided_slice %334 {offsets = [0, 0], sizes = [2, 32], strides = [1, 1]} : vector<2x128xf32> to vector<2x32xf32>
    %337 = vector.extract_strided_slice %334 {offsets = [0, 32], sizes = [2, 32], strides = [1, 1]} : vector<2x128xf32> to vector<2x32xf32>
    %338 = vector.extract_strided_slice %335 {offsets = [0, 64], sizes = [2, 32], strides = [1, 1]} : vector<2x128xf32> to vector<2x32xf32>
    %339 = vector.extract_strided_slice %334 {offsets = [0, 96], sizes = [2, 32], strides = [1, 1]} : vector<2x128xf32> to vector<2x32xf32>
    %340 = arith.mulf %337, %284 : vector<2x32xf32>
    %341 = arith.mulf %336, %338 : vector<2x32xf32>
    %342 = arith.addf %340, %341 : vector<2x32xf32>
    %343 = math.tanh %342 : vector<2x32xf32>
    %344 = arith.mulf %339, %343 : vector<2x32xf32>
    %345 = arith.negf %314 : vector<2x128xf32>
    %346 = math.exp %345 : vector<2x128xf32>
    %cst_66 = arith.constant 1.000000e+00 : f32
    %347 = vector.broadcast %cst_66 : f32 to vector<2x128xf32>
    %348 = arith.addf %347, %346 : vector<2x128xf32>
    %349 = arith.divf %347, %348 : vector<2x128xf32>
    %350 = math.tanh %314 : vector<2x128xf32>
    %351 = vector.extract_strided_slice %349 {offsets = [0, 0], sizes = [2, 32], strides = [1, 1]} : vector<2x128xf32> to vector<2x32xf32>
    %352 = vector.extract_strided_slice %349 {offsets = [0, 32], sizes = [2, 32], strides = [1, 1]} : vector<2x128xf32> to vector<2x32xf32>
    %353 = vector.extract_strided_slice %350 {offsets = [0, 64], sizes = [2, 32], strides = [1, 1]} : vector<2x128xf32> to vector<2x32xf32>
    %354 = vector.extract_strided_slice %349 {offsets = [0, 96], sizes = [2, 32], strides = [1, 1]} : vector<2x128xf32> to vector<2x32xf32>
    %355 = arith.mulf %352, %299 : vector<2x32xf32>
    %356 = arith.mulf %351, %353 : vector<2x32xf32>
    %357 = arith.addf %355, %356 : vector<2x32xf32>
    %358 = math.tanh %357 : vector<2x32xf32>
    %359 = arith.mulf %354, %358 : vector<2x32xf32>
    %360 = vector.extract_strided_slice %5 {offsets = [14, 0], sizes = [2, 128], strides = [1, 1]} : vector<16x128xf32> to vector<2x128xf32>
    %cst_67 = arith.constant dense<0.000000e+00> : vector<2x128xf32>
    %361 = tpu.matmul %329, %6, %cst_67 {dimension_numbers = #tpu.dot_dimension_numbers<[1], [0], [0], [1], [0, 0, 1, 1], [], []>} : vector<2x32xf32>, vector<32x128xf32>, vector<2x128xf32> -> vector<2x128xf32>
    %362 = arith.addf %360, %361 : vector<2x128xf32>
    %cst_68 = arith.constant dense<0.000000e+00> : vector<2x128xf32>
    %363 = tpu.matmul %329, %7, %cst_68 {dimension_numbers = #tpu.dot_dimension_numbers<[1], [0], [0], [1], [0, 0, 1, 1], [], []>} : vector<2x32xf32>, vector<32x128xf32>, vector<2x128xf32> -> vector<2x128xf32>
    %cst_69 = arith.constant dense<0.000000e+00> : vector<2x128xf32>
    %364 = tpu.matmul %344, %8, %cst_69 {dimension_numbers = #tpu.dot_dimension_numbers<[1], [0], [0], [1], [0, 0, 1, 1], [], []>} : vector<2x32xf32>, vector<32x128xf32>, vector<2x128xf32> -> vector<2x128xf32>
    %365 = arith.addf %363, %364 : vector<2x128xf32>
    %366 = vector.broadcast %9 : vector<1x128xf32> to vector<2x128xf32>
    %367 = arith.addf %365, %366 : vector<2x128xf32>
    %cst_70 = arith.constant dense<0.000000e+00> : vector<2x128xf32>
    %368 = tpu.matmul %344, %10, %cst_70 {dimension_numbers = #tpu.dot_dimension_numbers<[1], [0], [0], [1], [0, 0, 1, 1], [], []>} : vector<2x32xf32>, vector<32x128xf32>, vector<2x128xf32> -> vector<2x128xf32>
    %cst_71 = arith.constant dense<0.000000e+00> : vector<2x128xf32>
    %369 = tpu.matmul %359, %11, %cst_71 {dimension_numbers = #tpu.dot_dimension_numbers<[1], [0], [0], [1], [0, 0, 1, 1], [], []>} : vector<2x32xf32>, vector<32x128xf32>, vector<2x128xf32> -> vector<2x128xf32>
    %370 = arith.addf %368, %369 : vector<2x128xf32>
    %371 = vector.broadcast %12 : vector<1x128xf32> to vector<2x128xf32>
    %372 = arith.addf %370, %371 : vector<2x128xf32>
    %373 = arith.negf %362 : vector<2x128xf32>
    %374 = math.exp %373 : vector<2x128xf32>
    %cst_72 = arith.constant 1.000000e+00 : f32
    %375 = vector.broadcast %cst_72 : f32 to vector<2x128xf32>
    %376 = arith.addf %375, %374 : vector<2x128xf32>
    %377 = arith.divf %375, %376 : vector<2x128xf32>
    %378 = math.tanh %362 : vector<2x128xf32>
    %379 = vector.extract_strided_slice %377 {offsets = [0, 0], sizes = [2, 32], strides = [1, 1]} : vector<2x128xf32> to vector<2x32xf32>
    %380 = vector.extract_strided_slice %377 {offsets = [0, 32], sizes = [2, 32], strides = [1, 1]} : vector<2x128xf32> to vector<2x32xf32>
    %381 = vector.extract_strided_slice %378 {offsets = [0, 64], sizes = [2, 32], strides = [1, 1]} : vector<2x128xf32> to vector<2x32xf32>
    %382 = vector.extract_strided_slice %377 {offsets = [0, 96], sizes = [2, 32], strides = [1, 1]} : vector<2x128xf32> to vector<2x32xf32>
    %383 = arith.mulf %380, %327 : vector<2x32xf32>
    %384 = arith.mulf %379, %381 : vector<2x32xf32>
    %385 = arith.addf %383, %384 : vector<2x32xf32>
    %386 = math.tanh %385 : vector<2x32xf32>
    %387 = arith.mulf %382, %386 : vector<2x32xf32>
    %388 = arith.negf %367 : vector<2x128xf32>
    %389 = math.exp %388 : vector<2x128xf32>
    %cst_73 = arith.constant 1.000000e+00 : f32
    %390 = vector.broadcast %cst_73 : f32 to vector<2x128xf32>
    %391 = arith.addf %390, %389 : vector<2x128xf32>
    %392 = arith.divf %390, %391 : vector<2x128xf32>
    %393 = math.tanh %367 : vector<2x128xf32>
    %394 = vector.extract_strided_slice %392 {offsets = [0, 0], sizes = [2, 32], strides = [1, 1]} : vector<2x128xf32> to vector<2x32xf32>
    %395 = vector.extract_strided_slice %392 {offsets = [0, 32], sizes = [2, 32], strides = [1, 1]} : vector<2x128xf32> to vector<2x32xf32>
    %396 = vector.extract_strided_slice %393 {offsets = [0, 64], sizes = [2, 32], strides = [1, 1]} : vector<2x128xf32> to vector<2x32xf32>
    %397 = vector.extract_strided_slice %392 {offsets = [0, 96], sizes = [2, 32], strides = [1, 1]} : vector<2x128xf32> to vector<2x32xf32>
    %398 = arith.mulf %395, %342 : vector<2x32xf32>
    %399 = arith.mulf %394, %396 : vector<2x32xf32>
    %400 = arith.addf %398, %399 : vector<2x32xf32>
    %401 = math.tanh %400 : vector<2x32xf32>
    %402 = arith.mulf %397, %401 : vector<2x32xf32>
    %403 = arith.negf %372 : vector<2x128xf32>
    %404 = math.exp %403 : vector<2x128xf32>
    %cst_74 = arith.constant 1.000000e+00 : f32
    %405 = vector.broadcast %cst_74 : f32 to vector<2x128xf32>
    %406 = arith.addf %405, %404 : vector<2x128xf32>
    %407 = arith.divf %405, %406 : vector<2x128xf32>
    %408 = math.tanh %372 : vector<2x128xf32>
    %409 = vector.extract_strided_slice %407 {offsets = [0, 0], sizes = [2, 32], strides = [1, 1]} : vector<2x128xf32> to vector<2x32xf32>
    %410 = vector.extract_strided_slice %407 {offsets = [0, 32], sizes = [2, 32], strides = [1, 1]} : vector<2x128xf32> to vector<2x32xf32>
    %411 = vector.extract_strided_slice %408 {offsets = [0, 64], sizes = [2, 32], strides = [1, 1]} : vector<2x128xf32> to vector<2x32xf32>
    %412 = vector.extract_strided_slice %407 {offsets = [0, 96], sizes = [2, 32], strides = [1, 1]} : vector<2x128xf32> to vector<2x32xf32>
    %413 = arith.mulf %410, %357 : vector<2x32xf32>
    %414 = arith.mulf %409, %411 : vector<2x32xf32>
    %415 = arith.addf %413, %414 : vector<2x32xf32>
    %416 = math.tanh %415 : vector<2x32xf32>
    %417 = arith.mulf %412, %416 : vector<2x32xf32>
    %cst_75 = arith.constant dense<0.000000e+00> : vector<2x128xf32>
    %418 = tpu.matmul %387, %7, %cst_75 {dimension_numbers = #tpu.dot_dimension_numbers<[1], [0], [0], [1], [0, 0, 1, 1], [], []>} : vector<2x32xf32>, vector<32x128xf32>, vector<2x128xf32> -> vector<2x128xf32>
    %cst_76 = arith.constant dense<0.000000e+00> : vector<2x128xf32>
    %419 = tpu.matmul %402, %8, %cst_76 {dimension_numbers = #tpu.dot_dimension_numbers<[1], [0], [0], [1], [0, 0, 1, 1], [], []>} : vector<2x32xf32>, vector<32x128xf32>, vector<2x128xf32> -> vector<2x128xf32>
    %420 = arith.addf %418, %419 : vector<2x128xf32>
    %421 = vector.broadcast %9 : vector<1x128xf32> to vector<2x128xf32>
    %422 = arith.addf %420, %421 : vector<2x128xf32>
    %cst_77 = arith.constant dense<0.000000e+00> : vector<2x128xf32>
    %423 = tpu.matmul %402, %10, %cst_77 {dimension_numbers = #tpu.dot_dimension_numbers<[1], [0], [0], [1], [0, 0, 1, 1], [], []>} : vector<2x32xf32>, vector<32x128xf32>, vector<2x128xf32> -> vector<2x128xf32>
    %cst_78 = arith.constant dense<0.000000e+00> : vector<2x128xf32>
    %424 = tpu.matmul %417, %11, %cst_78 {dimension_numbers = #tpu.dot_dimension_numbers<[1], [0], [0], [1], [0, 0, 1, 1], [], []>} : vector<2x32xf32>, vector<32x128xf32>, vector<2x128xf32> -> vector<2x128xf32>
    %425 = arith.addf %423, %424 : vector<2x128xf32>
    %426 = vector.broadcast %12 : vector<1x128xf32> to vector<2x128xf32>
    %427 = arith.addf %425, %426 : vector<2x128xf32>
    %428 = arith.negf %422 : vector<2x128xf32>
    %429 = math.exp %428 : vector<2x128xf32>
    %cst_79 = arith.constant 1.000000e+00 : f32
    %430 = vector.broadcast %cst_79 : f32 to vector<2x128xf32>
    %431 = arith.addf %430, %429 : vector<2x128xf32>
    %432 = arith.divf %430, %431 : vector<2x128xf32>
    %433 = math.tanh %422 : vector<2x128xf32>
    %434 = vector.extract_strided_slice %432 {offsets = [0, 0], sizes = [2, 32], strides = [1, 1]} : vector<2x128xf32> to vector<2x32xf32>
    %435 = vector.extract_strided_slice %432 {offsets = [0, 32], sizes = [2, 32], strides = [1, 1]} : vector<2x128xf32> to vector<2x32xf32>
    %436 = vector.extract_strided_slice %433 {offsets = [0, 64], sizes = [2, 32], strides = [1, 1]} : vector<2x128xf32> to vector<2x32xf32>
    %437 = vector.extract_strided_slice %432 {offsets = [0, 96], sizes = [2, 32], strides = [1, 1]} : vector<2x128xf32> to vector<2x32xf32>
    %438 = arith.mulf %435, %400 : vector<2x32xf32>
    %439 = arith.mulf %434, %436 : vector<2x32xf32>
    %440 = arith.addf %438, %439 : vector<2x32xf32>
    %441 = math.tanh %440 : vector<2x32xf32>
    %442 = arith.mulf %437, %441 : vector<2x32xf32>
    %443 = arith.negf %427 : vector<2x128xf32>
    %444 = math.exp %443 : vector<2x128xf32>
    %cst_80 = arith.constant 1.000000e+00 : f32
    %445 = vector.broadcast %cst_80 : f32 to vector<2x128xf32>
    %446 = arith.addf %445, %444 : vector<2x128xf32>
    %447 = arith.divf %445, %446 : vector<2x128xf32>
    %448 = math.tanh %427 : vector<2x128xf32>
    %449 = vector.extract_strided_slice %447 {offsets = [0, 0], sizes = [2, 32], strides = [1, 1]} : vector<2x128xf32> to vector<2x32xf32>
    %450 = vector.extract_strided_slice %447 {offsets = [0, 32], sizes = [2, 32], strides = [1, 1]} : vector<2x128xf32> to vector<2x32xf32>
    %451 = vector.extract_strided_slice %448 {offsets = [0, 64], sizes = [2, 32], strides = [1, 1]} : vector<2x128xf32> to vector<2x32xf32>
    %452 = vector.extract_strided_slice %447 {offsets = [0, 96], sizes = [2, 32], strides = [1, 1]} : vector<2x128xf32> to vector<2x32xf32>
    %453 = arith.mulf %450, %415 : vector<2x32xf32>
    %454 = arith.mulf %449, %451 : vector<2x32xf32>
    %455 = arith.addf %453, %454 : vector<2x32xf32>
    %456 = math.tanh %455 : vector<2x32xf32>
    %457 = arith.mulf %452, %456 : vector<2x32xf32>
    %cst_81 = arith.constant dense<0.000000e+00> : vector<2x128xf32>
    %458 = tpu.matmul %442, %10, %cst_81 {dimension_numbers = #tpu.dot_dimension_numbers<[1], [0], [0], [1], [0, 0, 1, 1], [], []>} : vector<2x32xf32>, vector<32x128xf32>, vector<2x128xf32> -> vector<2x128xf32>
    %cst_82 = arith.constant dense<0.000000e+00> : vector<2x128xf32>
    %459 = tpu.matmul %457, %11, %cst_82 {dimension_numbers = #tpu.dot_dimension_numbers<[1], [0], [0], [1], [0, 0, 1, 1], [], []>} : vector<2x32xf32>, vector<32x128xf32>, vector<2x128xf32> -> vector<2x128xf32>
    %460 = arith.addf %458, %459 : vector<2x128xf32>
    %461 = vector.broadcast %12 : vector<1x128xf32> to vector<2x128xf32>
    %462 = arith.addf %460, %461 : vector<2x128xf32>
    %463 = arith.negf %462 : vector<2x128xf32>
    %464 = math.exp %463 : vector<2x128xf32>
    %cst_83 = arith.constant 1.000000e+00 : f32
    %465 = vector.broadcast %cst_83 : f32 to vector<2x128xf32>
    %466 = arith.addf %465, %464 : vector<2x128xf32>
    %467 = arith.divf %465, %466 : vector<2x128xf32>
    %468 = math.tanh %462 : vector<2x128xf32>
    %469 = vector.extract_strided_slice %467 {offsets = [0, 0], sizes = [2, 32], strides = [1, 1]} : vector<2x128xf32> to vector<2x32xf32>
    %470 = vector.extract_strided_slice %467 {offsets = [0, 32], sizes = [2, 32], strides = [1, 1]} : vector<2x128xf32> to vector<2x32xf32>
    %471 = vector.extract_strided_slice %468 {offsets = [0, 64], sizes = [2, 32], strides = [1, 1]} : vector<2x128xf32> to vector<2x32xf32>
    %472 = vector.extract_strided_slice %467 {offsets = [0, 96], sizes = [2, 32], strides = [1, 1]} : vector<2x128xf32> to vector<2x32xf32>
    %473 = arith.mulf %470, %455 : vector<2x32xf32>
    %474 = arith.mulf %469, %471 : vector<2x32xf32>
    %475 = arith.addf %473, %474 : vector<2x32xf32>
    %476 = math.tanh %475 : vector<2x32xf32>
    %477 = arith.mulf %472, %476 : vector<2x32xf32>
    %c0_84 = arith.constant 0 : index
    %c0_85 = arith.constant 0 : index
    %478 = vector.load %arg10[%c0_84, %c0_85] : memref<32x128xf32, #tpu.memory_space<vmem>>, vector<32x128xf32>
    %cst_86 = arith.constant dense<0.000000e+00> : vector<2x128xf32>
    %479 = tpu.matmul %477, %478, %cst_86 {dimension_numbers = #tpu.dot_dimension_numbers<[1], [0], [0], [1], [0, 0, 1, 1], [], []>} : vector<2x32xf32>, vector<32x128xf32>, vector<2x128xf32> -> vector<2x128xf32>
    %c0_87 = arith.constant 0 : index
    %c0_88 = arith.constant 0 : index
    %480 = vector.load %arg11[%c0_87, %c0_88] : memref<1x128xf32, #tpu.memory_space<vmem>>, vector<1x128xf32>
    %481 = vector.broadcast %480 : vector<1x128xf32> to vector<2x128xf32>
    %482 = arith.addf %479, %481 : vector<2x128xf32>
    %c0_89 = arith.constant 0 : index
    %c0_90 = arith.constant 0 : index
    %483 = vector.load %arg12[%c0_89, %c0_90] : memref<2x128xf32, #tpu.memory_space<vmem>>, vector<2x128xf32>
    tpu.vector_store %arg12[%c0_89, %c0_90], %482 {strides = array<i32>} : memref<2x128xf32, #tpu.memory_space<vmem>>, vector<2x128xf32>,
    return
  }
}

</mosaic_0001>

<bundles_post_ra>
// kernel: music_generator_forward.1
= control target key start
LH: loop header
LB: loop body
LE: loop exit
PB: predicated region body
PF: predicated region fallthrough
CT: control target
= control target key end

     0   :  { %vm51_vm0 = vcmask 64512   ;;  %v4772_v0 = vmov 0.0   ;;  %vm4773_vm1 = vmmov 0   ;;  %s4774_s17 = smov 64   ;;  %vm155_vm2 = vcmask 261120   ;;  %s5742_s1 = inlined_call_operand.vmem [shape: f32[8,128], index: 1, kind: input, shape index: {}]   ;;  %s5743_s3 = inlined_call_operand.vmem [shape: f32[32,128], index: 3, kind: input, shape index: {}]   ;;  %s5744_s0 = inlined_call_operand.vmem [shape: f32[16,8], index: 0, kind: input, shape index: {}]   ;;  %s5745_s2 = inlined_call_operand.vmem [shape: f32[1,128], index: 2, kind: input, shape index: {}]   ;;  %s5746_s5 = inlined_call_operand.vmem [shape: f32[32,128], index: 5, kind: input, shape index: {}]   ;;  %s5747_s4 = inlined_call_operand.vmem [shape: f32[32,128], index: 4, kind: input, shape index: {}]   ;;  %s5748_s6 = inlined_call_operand.vmem [shape: f32[1,128], index: 6, kind: input, shape index: {}]   ;;  %s5749_s8 = inlined_call_operand.vmem [shape: f32[32,128], index: 8, kind: input, shape index: {}]   ;;  %s5750_s7 = inlined_call_operand.vmem [shape: f32[32,128], index: 7, kind: input, shape index: {}]   ;;  %s5751_s9 = inlined_call_operand.vmem [shape: f32[1,128], index: 9, kind: input, shape index: {}]   ;;  %s5752_s10 = inlined_call_operand.vmem [shape: f32[32,128], index: 10, kind: input, shape index: {}]   ;;  %s5753_s11 = inlined_call_operand.vmem [shape: f32[1,128], index: 11, kind: input, shape index: {}]   ;;  %s5754_s12 = inlined_call_operand.vmem [shape: f32[2,128], index: 12, kind: output, shape index: {}]  }
   0x1   :  { %4103 = vmatprep.subr.mxu1 %v4772_v0  ;;  %v43_v1 = vld [vmem:[%s5742_s1] sm:$0xff]  ;;  %v4848_v2 = vld [vmem:[%s5743_s3 + $0x18] sm:$0xff]  ;;  %4111 = vmatprep.mubr.msk.f32.mxu1 %vm4773_vm1, %v4772_v0  ;;  %v42_v4 = vld [vmem:[%s5744_s0 + $0x8] sm:$0xff] }
   0x2   :  { %v41_v3 = vld [vmem:[%s5744_s0] sm:$0xff]  ;;  %4098 = vmatprep.subr.mxu0 %v43_v1  ;;  %4104 = vmatpush3.msra.mxu1 %v4848_v2  ;;  %v4862_v5 = vld [vmem:[%s5743_s3 + $0x10] sm:$0xff]  ;;  %v4868_v6 = vld [vmem:[%s5743_s3 + $0x8] sm:$0xff] }
   0x3   :  { %4099 = vmatpush3.msra.mxu0 %v43_v1  ;;  %4100 = vmatprep.mubr.msk.f32.mxu0 %vm51_vm0, %v41_v3  ;;  %v4876_v7 = vld [vmem:[%s5743_s3] sm:$0xff]  ;;  %v4912_v27 = vld [vmem:[%s5746_s5 + $0x18] sm:$0xff]  ;;  %v4919_v28 = vld [vmem:[%s5746_s5 + $0x10] sm:$0xff] }
   0x4   :  { %4105 = vmatprep.subr.mxu1 %v4772_v0  ;;  %4101 = vmatmul.mubr.msk.f32.vlgmr.msra.gmra.mxu0 %vm51_vm0, %v42_v4  ;;  %v3822_v8 = vld [vmem:[%s5745_s2] ss:$0 sm:$0xff]  ;;  %s4775_s2 = smov 32   ;;  %v4926_v29 = vld [vmem:[%s5746_s5 + $0x8] sm:$0xff]  ;;  %v4952_v33 = vld [vmem:[%s5747_s4 + $0x18] sm:$0xff] }
   0x5   :  { %4106 = vmatpush3.msra.mxu1 %v4862_v5  ;;  %4114 = vmatprep.subr.mxu0 %v4772_v0  ;;  %v4933_v30 = vld [vmem:[%s5746_s5] sm:$0xff]  ;;  %v4958_v35 = vld [vmem:[%s5747_s4 + $0x10] sm:$0xff]  ;;  %v4967_v36 = vld [vmem:[%s5747_s4 + $0x8] sm:$0xff] }
   0x6   :  { %4107 = vmatprep.subr.mxu1 %v4772_v0  ;;  %4115 = vmatpush3.msra.mxu0 %v4848_v2  ;;  %v4974_v37 = vld [vmem:[%s5747_s4] sm:$0xff] }
   0x7   :  { %4108 = vmatpush3.msra.mxu1 %v4868_v6  ;;  %4116 = vmatprep.subr.mxu0 %v4772_v0  ;;  %v4995_v44 = vld [vmem:[%s5748_s6] ss:$0 sm:$0xff] }
   0x8   :  { %4109 = vmatprep.subr.mxu1 %v4772_v0  ;;  %4117 = vmatpush3.msra.mxu0 %v4862_v5 }
   0x9   :  { %4110 = vmatpush3.msra.mxu1 %v4876_v7  ;;  %4118 = vmatprep.subr.mxu0 %v4772_v0 }
   0xa   :  { %4112 = vmatmul.mubr.f32.vlgmr.msra.gmra.mxu1 %v4772_v0  ;;  %4119 = vmatpush3.msra.mxu0 %v4868_v6 }
   0xb   :  { %4120 = vmatprep.subr.mxu0 %v4772_v0  ;;  %4122 = vmatprep.mubr.msk.f32.mxu0 %vm4773_vm1, %v4772_v0 }
   0xc   :  { %4121 = vmatpush3.msra.mxu0 %v4876_v7  ;;  %4125 = vmatprep.subr.mxu1 %v4772_v0 }
   0xd   :  { %4136 = vmatprep.subr.mxu0 %v4772_v0  ;;  %4133 = vmatprep.mubr.msk.f32.mxu1 %vm4773_vm1, %v4772_v0 }
   0xe   :  { %4126 = vmatpush3.msra.mxu1 %v4912_v27 }
   0xf   :  { %4127 = vmatprep.subr.mxu1 %v4772_v0 }
  0x10   :  { %4128 = vmatpush3.msra.mxu1 %v4919_v28 }
  0x11   :  { %4129 = vmatprep.subr.mxu1 %v4772_v0 }
  0x12   :  { %4130 = vmatpush3.msra.mxu1 %v4926_v29 }
  0x13   :  { %4131 = vmatprep.subr.mxu1 %v4772_v0 }
  0x14   :  { %4132 = vmatpush3.msra.mxu1 %v4933_v30 }
  0x15   :  { %4134 = vmatmul.mubr.f32.vlgmr.msra.gmra.mxu1 %v4772_v0  ;;  %4147 = vmatprep.subr.mxu1 %v4772_v0 }
  0x16   :  { %4148 = vmatpush3.msra.mxu1 %v4848_v2  ;;  %4155 = vmatprep.mubr.msk.f32.mxu1 %vm4773_vm1, %v4772_v0 }
  0x17   :  { %4149 = vmatprep.subr.mxu1 %v4772_v0 }
  0x18   :  { %4150 = vmatpush3.msra.mxu1 %v4862_v5 }
  0x19   :  { %4151 = vmatprep.subr.mxu1 %v4772_v0 }
  0x1a   :  { %4152 = vmatpush3.msra.mxu1 %v4868_v6 }
  0x1b   :  { %4153 = vmatprep.subr.mxu1 %v4772_v0 }
  0x1c   :  { %4154 = vmatpush3.msra.mxu1 %v4876_v7 }
  0x1d   :  { %4169 = vmatprep.subr.mxu1 %v4772_v0 }
  0xc4   :  { %v4102_v9 = vpop.f32.mrf.mxu0 }
  0xc5   :  { %v4898_v10 = vadd.f32 %v4102_v9, %v3822_v8 }
  0xc6   :  { %v124_v11 = vpop.f32.mrf.mxu0 }
  0xc7   :  { %v4900_v12 = vadd.f32 %v3822_v8, %v124_v11 }
  0xca   :  { %v225_v13 = vpop.f32.mrf.mxu1 }
  0xcb   :  { %v229_v14 = vadd.f32 %v225_v13, %v4900_v12 }
  0xcc   :  { %v4113_v15 = vpop.f32.mrf.mxu1 }
  0xcd   :  { %4558 = vtanh.f32 %v229_v14  ;;  %v3825_v17 = vmul.f32 -1.442695, %v229_v14 }
  0xcf   :  { %4560 = vpow2.f32 %v3825_v17 }
  0xd5   :  { %v399_v38 = vpop.f32.mrf.mxu1 }
  0xd7   :  { %v4135_v39 = vpop.f32.mrf.mxu1 }
  0xda   :  { %v4559_v16 = vpop.eup %4558 }
  0xdb   :  { %239 = vrot.lane.b32.xlu0 %v4559_v16, %s4774_s17 }
  0xdc   :  { %v4561_v18 = vpop.eup %4560 }
  0xdd   :  { %v233_v19 = vadd.f32 1.0, %v4561_v18 }
  0xdf   :  { %4562 = vrcp.f32 %v233_v19 }
  0xec   :  { %v4563_v20 = vpop.eup %4562 }
  0xed   :  { %v237_v23 = vmul.f32 0.0, %v4563_v20 }
 0x14d   :  { %v240_v21 = vpop.permute.xlu0 %239 }
 0x14e   :  { %v242_v22 = vmul.f32 %v4563_v20, %v240_v21  ;;  %v5023_v21 = vld [vmem:[%s5749_s8 + $0x18] sm:$0xff] }
 0x150   :  { %244 = vrot.lane.b32.xlu0 %v242_v22, %s4775_s2 }
 0x1c2   :  { %v245_v24 = vpop.permute.xlu0 %244 }
 0x1c3   :  { %v4905_v25 = vadd.f32 %v245_v24, %v237_v23  ;;  %v5031_v23 = vld [vmem:[%s5750_s7 + $0x18] sm:$0xff]  ;;  %v5038_v24 = vld [vmem:[%s5749_s8 + $0x10] sm:$0xff] }
 0x1c5   :  { %4564 = vtanh.f32 %v4905_v25  ;;  %v488_v63 = vrot.slane %v4905_v25, 6  ;;  %v5045_v25 = vld [vmem:[%s5750_s7 + $0x10] sm:$0xff] }
 0x1d2   :  { %v4565_v26 = vpop.eup %4564 }
 0x1d3   :  { %250 = vrot.lane.b32.xlu1 %v4565_v26, %s4774_s17  ;;  %v5052_v26 = vld [vmem:[%s5749_s8 + $0x8] sm:$0xff] }
 0x245   :  { %v251_v31 = vpop.permute.xlu1 %250 }
 0x246   :  { %v253_v32 = vmul.f32 %v4563_v20, %v251_v31  ;;  %v5059_v31 = vld [vmem:[%s5750_s7 + $0x8] sm:$0xff] }
 0x248   :  { %255 = vrot.lane.b32.xlu1 %v253_v32, %s4775_s2  ;;  %v5066_v32 = vld [vmem:[%s5749_s8] sm:$0xff] }
 0x2ba   :  { %v256_v34 = vpop.permute.xlu1 %255 }
 0x2bb   :  { %4123 = vmatmul.mubr.msk.f32.vlgmr.msra.gmra.mxu0 %vm155_vm2, %v256_v34 }
 0x2bc   :  { %4137 = vmatpush3.msra.mxu0 %v4952_v33  ;;  %4144 = vmatprep.mubr.msk.f32.mxu0 %vm4773_vm1, %v4772_v0 }
 0x2bd   :  { %4138 = vmatprep.subr.mxu0 %v4772_v0 }
 0x2be   :  { %4139 = vmatpush3.msra.mxu0 %v4958_v35 }
 0x2bf   :  { %4140 = vmatprep.subr.mxu0 %v4772_v0 }
 0x2c0   :  { %4141 = vmatpush3.msra.mxu0 %v4967_v36 }
 0x2c1   :  { %4142 = vmatprep.subr.mxu0 %v4772_v0 }
 0x2c2   :  { %4143 = vmatpush3.msra.mxu0 %v4974_v37 }
 0x2c3   :  { %4145 = vmatmul.mubr.msk.f32.vlgmr.msra.gmra.mxu0 %vm155_vm2, %v256_v34  ;;  %4158 = vmatprep.subr.mxu0 %v4772_v0  ;;  %v5073_v34 = vld [vmem:[%s5750_s7] sm:$0xff] }
 0x2c4   :  { %4159 = vmatpush3.msra.mxu0 %v4912_v27  ;;  %4166 = vmatprep.mubr.msk.f32.mxu0 %vm4773_vm1, %v4772_v0 }
 0x2c5   :  { %4160 = vmatprep.subr.mxu0 %v4772_v0 }
 0x2c6   :  { %4161 = vmatpush3.msra.mxu0 %v4919_v28 }
 0x2c7   :  { %4162 = vmatprep.subr.mxu0 %v4772_v0 }
 0x2c8   :  { %4163 = vmatpush3.msra.mxu0 %v4926_v29 }
 0x2c9   :  { %4164 = vmatprep.subr.mxu0 %v4772_v0 }
 0x2ca   :  { %4165 = vmatpush3.msra.mxu0 %v4933_v30 }
 0x2cb   :  { %4180 = vmatprep.subr.mxu0 %v4772_v0 }
 0x37b   :  { %v325_v40 = vpop.f32.mrf.mxu0 }
 0x37c   :  { %v330_v41 = vrot.slane %v325_v40, 6 }
 0x37d   :  { %v4124_v42 = vpop.f32.mrf.mxu0 }
 0x37e   :  { %v332_v43 = vadd.f32 %v330_v41, %v4900_v12 }
 0x380   :  { %4566 = vtanh.f32 %v332_v43  ;;  %v3829_v51 = vmul.f32 -1.442695, %v332_v43 }
 0x383   :  { %v469_v45 = vpop.f32.mrf.mxu0 }
 0x384   :  { %v470_v46 = vadd.f32 %v469_v45, %v399_v38 }
 0x385   :  { %v4146_v47 = vpop.f32.mrf.mxu0 }
 0x386   :  { %v479_v48 = vadd.f32 %v4995_v44, %v470_v46 }
 0x388   :  { %4568 = vtanh.f32 %v479_v48  ;;  %v3830_v52 = vmul.f32 -1.442695, %v479_v48 }
 0x389   :  { %4570 = vpow2.f32 %v3829_v51 }
 0x38a   :  { %4572 = vpow2.f32 %v3830_v52 }
 0x38d   :  { %v4567_v49 = vpop.eup %4566 }
 0x38e   :  { %492 = vrot.lane.b32.xlu0 %v4567_v49, %s4774_s17 }
 0x395   :  { %v4569_v50 = vpop.eup %4568 }
 0x396   :  { %516 = vrot.lane.b32.xlu1 %v4569_v50, %s4774_s17  ;;  %v4571_v53 = vpop.eup %4570  ;;  %v5113_v50 = vld [vmem:[%s5751_s9] ss:$0 sm:$0xff] }
 0x397   :  { %v483_v54 = vadd.f32 1.0, %v4571_v53  ;;  %v4573_v55 = vpop.eup %4572 }
 0x398   :  { %v510_v56 = vadd.f32 1.0, %v4573_v55 }
 0x399   :  { %4574 = vrcp.f32 %v483_v54 }
 0x39a   :  { %4576 = vrcp.f32 %v510_v56 }
 0x3a6   :  { %v4575_v57 = vpop.eup %4574 }
 0x3a7   :  { %v4577_v60 = vpop.eup %4576  ;;  %v490_v1 = vmul.f32 %v4575_v57, %v488_v63 }
 0x3a8   :  { %v514_v8 = vmul.f32 0.0, %v4577_v60 }
 0x400   :  { %v493_v58 = vpop.permute.xlu0 %492 }
 0x401   :  { %v495_v59 = vmul.f32 %v4575_v57, %v493_v58 }
 0x403   :  { %497 = vrot.lane.b32.xlu0 %v495_v59, %s4775_s2 }
 0x408   :  { %v517_v61 = vpop.permute.xlu1 %516 }
 0x409   :  { %v519_v62 = vmul.f32 %v4577_v60, %v517_v61 }
 0x40b   :  { %521 = vrot.lane.b32.xlu1 %v519_v62, %s4775_s2 }
 0x475   :  { %v498_v3 = vpop.permute.xlu0 %497 }
 0x476   :  { %v5003_v4 = vadd.f32 %v498_v3, %v490_v1 }
 0x478   :  { %4578 = vtanh.f32 %v5003_v4 }
 0x47d   :  { %v522_v9 = vpop.permute.xlu1 %521 }
 0x47e   :  { %v5006_v11 = vadd.f32 %v522_v9, %v514_v8 }
 0x480   :  { %4580 = vtanh.f32 %v5006_v11 }
 0x485   :  { %v4579_v13 = vpop.eup %4578 }
 0x486   :  { %503 = vrot.lane.b32.xlu0 %v4579_v13, %s4774_s17 }
 0x48d   :  { %v4581_v14 = vpop.eup %4580 }
 0x48e   :  { %527 = vrot.lane.b32.xlu1 %v4581_v14, %s4774_s17 }
 0x4f8   :  { %v504_v15 = vpop.permute.xlu0 %503 }
 0x4f9   :  { %v506_v16 = vmul.f32 %v4575_v57, %v504_v15 }
 0x4fb   :  { %v532_v17 = vrot.slane %v506_v16, 2 }
 0x4fd   :  { %533 = vrot.lane.b32.xlu0 %v532_v17, %s4775_s2 }
 0x500   :  { %v528_v18 = vpop.permute.xlu1 %527 }
 0x501   :  { %v530_v19 = vmul.f32 %v4577_v60, %v528_v18 }
 0x503   :  { %612 = vrot.lane.b32.xlu1 %v530_v19, %s4775_s2 }
 0x56f   :  { %v534_v20 = vpop.permute.xlu0 %533 }
 0x570   :  { %4156 = vmatmul.mubr.msk.f32.vlgmr.msra.gmra.mxu1 %vm155_vm2, %v534_v20 }
 0x571   :  { %4170 = vmatpush3.msra.mxu1 %v4952_v33  ;;  %4177 = vmatprep.mubr.msk.f32.mxu1 %vm4773_vm1, %v4772_v0 }
 0x572   :  { %4171 = vmatprep.subr.mxu1 %v4772_v0 }
 0x573   :  { %4172 = vmatpush3.msra.mxu1 %v4958_v35 }
 0x574   :  { %4173 = vmatprep.subr.mxu1 %v4772_v0 }
 0x575   :  { %4174 = vmatpush3.msra.mxu1 %v4967_v36  ;;  %v613_v22 = vpop.permute.xlu1 %612 }
 0x576   :  { %4167 = vmatmul.mubr.msk.f32.vlgmr.msra.gmra.mxu0 %vm155_vm2, %v613_v22  ;;  %4175 = vmatprep.subr.mxu1 %v4772_v0 }
 0x577   :  { %4176 = vmatpush3.msra.mxu1 %v4974_v37  ;;  %4181 = vmatpush3.msra.mxu0 %v5023_v21 }
 0x578   :  { %4178 = vmatmul.mubr.msk.f32.vlgmr.msra.gmra.mxu1 %vm155_vm2, %v534_v20  ;;  %4191 = vmatprep.subr.mxu1 %v4772_v0 }
 0x579   :  { %4192 = vmatpush3.msra.mxu1 %v5031_v23  ;;  %4182 = vmatprep.subr.mxu0 %v4772_v0 }
 0x57a   :  { %4193 = vmatprep.subr.mxu1 %v4772_v0  ;;  %4183 = vmatpush3.msra.mxu0 %v5038_v24 }
 0x57b   :  { %4194 = vmatpush3.msra.mxu1 %v5045_v25  ;;  %4184 = vmatprep.subr.mxu0 %v4772_v0 }
 0x57c   :  { %4195 = vmatprep.subr.mxu1 %v4772_v0  ;;  %4185 = vmatpush3.msra.mxu0 %v5052_v26 }
 0x57d   :  { %4196 = vmatpush3.msra.mxu1 %v5059_v31  ;;  %4186 = vmatprep.subr.mxu0 %v4772_v0 }
 0x57e   :  { %4197 = vmatprep.subr.mxu1 %v4772_v0  ;;  %4187 = vmatpush3.msra.mxu0 %v5066_v32 }
 0x57f   :  { %4188 = vmatprep.mubr.msk.f32.mxu0 %vm4773_vm1, %v4772_v0  ;;  %4198 = vmatpush3.msra.mxu1 %v5073_v34 }
 0x580   :  { %4199 = vmatprep.mubr.msk.f32.mxu1 %vm4773_vm1, %v4772_v0  ;;  %4189 = vmatmul.mubr.f32.vlgmr.msra.gmra.mxu0 %v4772_v0 }
 0x581   :  { %4200 = vmatmul.mubr.msk.f32.vlgmr.msra.gmra.mxu1 %vm155_vm2, %v613_v22  ;;  %4202 = vmatprep.subr.mxu0 %v4772_v0 }
 0x582   :  { %4203 = vmatpush3.msra.mxu0 %v4848_v2  ;;  %4213 = vmatprep.subr.mxu1 %v4772_v0 }
 0x583   :  { %4204 = vmatprep.subr.mxu0 %v4772_v0  ;;  %4214 = vmatpush3.msra.mxu1 %v4912_v27 }
 0x584   :  { %4205 = vmatpush3.msra.mxu0 %v4862_v5  ;;  %4210 = vmatprep.mubr.msk.f32.mxu0 %vm4773_vm1, %v4772_v0 }
 0x585   :  { %4206 = vmatprep.subr.mxu0 %v4772_v0  ;;  %4215 = vmatprep.subr.mxu1 %v4772_v0 }
 0x586   :  { %4207 = vmatpush3.msra.mxu0 %v4868_v6  ;;  %4216 = vmatpush3.msra.mxu1 %v4919_v28 }
 0x587   :  { %4208 = vmatprep.subr.mxu0 %v4772_v0  ;;  %4217 = vmatprep.subr.mxu1 %v4772_v0 }
 0x588   :  { %4209 = vmatpush3.msra.mxu0 %v4876_v7  ;;  %4218 = vmatpush3.msra.mxu1 %v4926_v29 }
 0x589   :  { %4224 = vmatprep.subr.mxu0 %v4772_v0  ;;  %4219 = vmatprep.subr.mxu1 %v4772_v0 }
 0x58a   :  { %4220 = vmatpush3.msra.mxu1 %v4933_v30  ;;  %4221 = vmatprep.mubr.msk.f32.mxu1 %vm4773_vm1, %v4772_v0 }
 0x58b   :  { %4235 = vmatprep.subr.mxu1 %v4772_v0 }
 0x630   :  { %v603_v38 = vpop.f32.mrf.mxu1 }
 0x631   :  { %v608_v39 = vrot.slane %v603_v38, 4  ;;  %v912_v38 = vrot.slane %v5003_v4, 6 }
 0x632   :  { %v4157_v40 = vpop.f32.mrf.mxu1 }
 0x633   :  { %v610_v41 = vadd.f32 %v608_v39, %v4900_v12 }
 0x635   :  { %4582 = vtanh.f32 %v610_v41  ;;  %v3836_v59 = vmul.f32 -1.442695, %v610_v41 }
 0x636   :  { %v682_v42 = vpop.f32.mrf.mxu0 }
 0x638   :  { %v4168_v43 = vpop.f32.mrf.mxu0  ;;  %v752_v45 = vpop.f32.mrf.mxu1 }
 0x639   :  { %v753_v46 = vadd.f32 %v752_v45, %v682_v42 }
 0x63a   :  { %v4179_v47 = vpop.f32.mrf.mxu1 }
 0x63b   :  { %v756_v48 = vadd.f32 %v4995_v44, %v753_v46 }
 0x63d   :  { %4584 = vtanh.f32 %v756_v48  ;;  %v3837_v60 = vmul.f32 -1.442695, %v756_v48 }
 0x640   :  { %v823_v49 = vpop.f32.mrf.mxu0 }
 0x641   :  { %v893_v51 = vpop.f32.mrf.mxu1 }
 0x642   :  { %v4583_v52 = vpop.eup %4582  ;;  %v894_v53 = vadd.f32 %v893_v51, %v823_v49  ;;  %v4190_v54 = vpop.f32.mrf.mxu0 }
 0x643   :  { %v4201_v55 = vpop.f32.mrf.mxu1  ;;  %916 = vrot.lane.b32.xlu0 %v4583_v52, %s4774_s17 }
 0x644   :  { %v903_v56 = vadd.f32 %v5113_v50, %v894_v53 }
 0x646   :  { %4586 = vtanh.f32 %v903_v56  ;;  %v3838_v62 = vmul.f32 -1.442695, %v903_v56 }
 0x647   :  { %4588 = vpow2.f32 %v3836_v59 }
 0x648   :  { %4590 = vpow2.f32 %v3837_v60 }
 0x649   :  { %4592 = vpow2.f32 %v3838_v62 }
 0x64a   :  { %v4585_v57 = vpop.eup %4584 }
 0x64b   :  { %940 = vrot.lane.b32.xlu1 %v4585_v57, %s4774_s17 }
 0x653   :  { %v4587_v58 = vpop.eup %4586 }
 0x654   :  { %964 = vrot.lane.b32.xlu0 %v4587_v58, %s4774_s17  ;;  %v4589_v61 = vpop.eup %4588 }
 0x655   :  { %v907_v63 = vadd.f32 1.0, %v4589_v61  ;;  %v4591_v1 = vpop.eup %4590 }
 0x656   :  { %v934_v3 = vadd.f32 1.0, %v4591_v1  ;;  %v4593_v8 = vpop.eup %4592 }
 0x657   :  { %4594 = vrcp.f32 %v907_v63  ;;  %v958_v13 = vadd.f32 1.0, %v4593_v8 }
 0x658   :  { %4596 = vrcp.f32 %v934_v3 }
 0x659   :  { %4598 = vrcp.f32 %v958_v13 }
 0x664   :  { %v4595_v9 = vpop.eup %4594 }
 0x665   :  { %v4597_v16 = vpop.eup %4596  ;;  %v914_v39 = vmul.f32 %v4595_v9, %v912_v38 }
 0x666   :  { %v4599_v19 = vpop.eup %4598  ;;  %v938_v42 = vmul.f32 %v4597_v16, %v5006_v11 }
 0x667   :  { %v962_v47 = vmul.f32 0.0, %v4599_v19 }
 0x6b5   :  { %v917_v14 = vpop.permute.xlu0 %916 }
 0x6b6   :  { %v919_v15 = vmul.f32 %v4595_v9, %v917_v14 }
 0x6b8   :  { %921 = vrot.lane.b32.xlu1 %v919_v15, %s4775_s2 }
 0x6bd   :  { %v941_v17 = vpop.permute.xlu1 %940 }
 0x6be   :  { %v943_v18 = vmul.f32 %v4597_v16, %v941_v17 }
 0x6c0   :  { %945 = vrot.lane.b32.xlu0 %v943_v18, %s4775_s2 }
 0x6c6   :  { %v965_v20 = vpop.permute.xlu0 %964 }
 0x6c7   :  { %v967_v22 = vmul.f32 %v4599_v19, %v965_v20 }
 0x6c9   :  { %969 = vrot.lane.b32.xlu1 %v967_v22, %s4775_s2 }
 0x72a   :  { %v922_v40 = vpop.permute.xlu1 %921 }
 0x72b   :  { %v5123_v41 = vadd.f32 %v922_v40, %v914_v39 }
 0x72d   :  { %4600 = vtanh.f32 %v5123_v41 }
 0x732   :  { %v946_v43 = vpop.permute.xlu0 %945 }
 0x733   :  { %v5127_v45 = vadd.f32 %v946_v43, %v938_v42 }
 0x735   :  { %4602 = vtanh.f32 %v5127_v45 }
 0x73a   :  { %v4601_v46 = vpop.eup %4600 }
 0x73b   :  { %v970_v48 = vpop.permute.xlu1 %969  ;;  %927 = vrot.lane.b32.xlu0 %v4601_v46, %s4774_s17 }
 0x73c   :  { %v5131_v49 = vadd.f32 %v970_v48, %v962_v47 }
 0x73e   :  { %4604 = vtanh.f32 %v5131_v49 }
 0x742   :  { %v4603_v4 = vpop.eup %4602 }
 0x743   :  { %951 = vrot.lane.b32.xlu1 %v4603_v4, %s4774_s17 }
 0x74b   :  { %v4605_v51 = vpop.eup %4604 }
 0x74c   :  { %975 = vrot.lane.b32.xlu0 %v4605_v51, %s4774_s17 }
 0x7ad   :  { %v928_v11 = vpop.permute.xlu0 %927 }
 0x7ae   :  { %v930_v52 = vmul.f32 %v4595_v9, %v928_v11 }
 0x7b0   :  { %v980_v53 = vrot.slane %v930_v52, 4 }
 0x7b2   :  { %981 = vrot.lane.b32.xlu1 %v980_v53, %s4775_s2 }
 0x7b5   :  { %v952_v54 = vpop.permute.xlu1 %951 }
 0x7b6   :  { %v954_v55 = vmul.f32 %v4597_v16, %v952_v54 }
 0x7b8   :  { %1060 = vrot.lane.b32.xlu0 %v954_v55, %s4775_s2 }
 0x7be   :  { %v976_v56 = vpop.permute.xlu0 %975 }
 0x7bf   :  { %v978_v57 = vmul.f32 %v4599_v19, %v976_v56 }
 0x7c1   :  { %1206 = vrot.lane.b32.xlu1 %v978_v57, %s4775_s2 }
 0x824   :  { %v982_v58 = vpop.permute.xlu1 %981 }
 0x825   :  { %4211 = vmatmul.mubr.msk.f32.vlgmr.msra.gmra.mxu0 %vm155_vm2, %v982_v58 }
 0x826   :  { %4225 = vmatpush3.msra.mxu0 %v4952_v33  ;;  %4232 = vmatprep.mubr.msk.f32.mxu0 %vm4773_vm1, %v4772_v0 }
 0x827   :  { %4226 = vmatprep.subr.mxu0 %v4772_v0 }
 0x828   :  { %4227 = vmatpush3.msra.mxu0 %v4958_v35 }
 0x829   :  { %4228 = vmatprep.subr.mxu0 %v4772_v0 }
 0x82a   :  { %4229 = vmatpush3.msra.mxu0 %v4967_v36  ;;  %v1061_v59 = vpop.permute.xlu0 %1060 }
 0x82b   :  { %4222 = vmatmul.mubr.msk.f32.vlgmr.msra.gmra.mxu1 %vm155_vm2, %v1061_v59  ;;  %4230 = vmatprep.subr.mxu0 %v4772_v0 }
 0x82c   :  { %4231 = vmatpush3.msra.mxu0 %v4974_v37  ;;  %4236 = vmatpush3.msra.mxu1 %v5023_v21 }
 0x82d   :  { %4233 = vmatmul.mubr.msk.f32.vlgmr.msra.gmra.mxu0 %vm155_vm2, %v982_v58  ;;  %4237 = vmatprep.subr.mxu1 %v4772_v0 }
 0x82e   :  { %4246 = vmatprep.subr.mxu0 %v4772_v0  ;;  %4238 = vmatpush3.msra.mxu1 %v5038_v24 }
 0x82f   :  { %4247 = vmatpush3.msra.mxu0 %v5031_v23  ;;  %4239 = vmatprep.subr.mxu1 %v4772_v0 }
 0x830   :  { %4248 = vmatprep.subr.mxu0 %v4772_v0  ;;  %4240 = vmatpush3.msra.mxu1 %v5052_v26 }
 0x831   :  { %4249 = vmatpush3.msra.mxu0 %v5045_v25  ;;  %4241 = vmatprep.subr.mxu1 %v4772_v0 }
 0x832   :  { %4250 = vmatprep.subr.mxu0 %v4772_v0  ;;  %4242 = vmatpush3.msra.mxu1 %v5066_v32 }
 0x833   :  { %4251 = vmatpush3.msra.mxu0 %v5059_v31  ;;  %v1207_v60 = vpop.permute.xlu1 %1206  ;;  %4243 = vmatprep.mubr.msk.f32.mxu1 %vm4773_vm1, %v4772_v0 }
 0x834   :  { %4244 = vmatmul.mubr.msk.f32.vlgmr.msra.gmra.mxu1 %vm155_vm2, %v1207_v60  ;;  %4252 = vmatprep.subr.mxu0 %v4772_v0 }
 0x835   :  { %4253 = vmatpush3.msra.mxu0 %v5073_v34  ;;  %4254 = vmatprep.mubr.msk.f32.mxu0 %vm4773_vm1, %v4772_v0 }
 0x836   :  { %4255 = vmatmul.mubr.msk.f32.vlgmr.msra.gmra.mxu0 %vm155_vm2, %v1061_v59  ;;  %4257 = vmatprep.subr.mxu1 %v4772_v0 }
 0x837   :  { %4258 = vmatpush3.msra.mxu1 %v4848_v2  ;;  %4268 = vmatprep.subr.mxu0 %v4772_v0 }
 0x838   :  { %4259 = vmatprep.subr.mxu1 %v4772_v0  ;;  %4269 = vmatpush3.msra.mxu0 %v4912_v27 }
 0x839   :  { %4260 = vmatpush3.msra.mxu1 %v4862_v5  ;;  %4265 = vmatprep.mubr.msk.f32.mxu1 %vm4773_vm1, %v4772_v0 }
 0x83a   :  { %4261 = vmatprep.subr.mxu1 %v4772_v0  ;;  %4270 = vmatprep.subr.mxu0 %v4772_v0 }
 0x83b   :  { %4262 = vmatpush3.msra.mxu1 %v4868_v6  ;;  %4271 = vmatpush3.msra.mxu0 %v4919_v28 }
 0x83c   :  { %4263 = vmatprep.subr.mxu1 %v4772_v0  ;;  %4272 = vmatprep.subr.mxu0 %v4772_v0 }
 0x83d   :  { %4264 = vmatpush3.msra.mxu1 %v4876_v7  ;;  %4273 = vmatpush3.msra.mxu0 %v4926_v29 }
 0x83e   :  { %4279 = vmatprep.subr.mxu1 %v4772_v0  ;;  %4274 = vmatprep.subr.mxu0 %v4772_v0 }
 0x83f   :  { %4275 = vmatpush3.msra.mxu0 %v4933_v30  ;;  %4276 = vmatprep.mubr.msk.f32.mxu0 %vm4773_vm1, %v4772_v0 }
 0x840   :  { %4290 = vmatprep.subr.mxu0 %v4772_v0 }
 0x8e5   :  { %v1051_v61 = vpop.f32.mrf.mxu0 }
 0x8e6   :  { %v1056_v62 = vrot.slane %v1051_v61, 2  ;;  %v1359_v61 = vrot.slane %v5123_v41, 6 }
 0x8e7   :  { %v4212_v63 = vpop.f32.mrf.mxu0 }
 0x8e8   :  { %v1058_v1 = vadd.f32 %v1056_v62, %v4900_v12 }
 0x8ea   :  { %4606 = vtanh.f32 %v1058_v1  ;;  %v3844_v40 = vmul.f32 -1.442695, %v1058_v1 }
 0x8eb   :  { %v1130_v3 = vpop.f32.mrf.mxu1 }
 0x8ed   :  { %v4223_v8 = vpop.f32.mrf.mxu1  ;;  %v1200_v9 = vpop.f32.mrf.mxu0 }
 0x8ee   :  { %v1201_v13 = vadd.f32 %v1200_v9, %v1130_v3 }
 0x8ef   :  { %v4234_v14 = vpop.f32.mrf.mxu0 }
 0x8f0   :  { %v1204_v15 = vadd.f32 %v4995_v44, %v1201_v13 }
 0x8f2   :  { %4608 = vtanh.f32 %v1204_v15  ;;  %v3845_v42 = vmul.f32 -1.442695, %v1204_v15 }
 0x8f4   :  { %v1276_v16 = vpop.f32.mrf.mxu1 }
 0x8f6   :  { %v4245_v17 = vpop.f32.mrf.mxu1  ;;  %v1346_v18 = vpop.f32.mrf.mxu0 }
 0x8f7   :  { %v4607_v19 = vpop.eup %4606  ;;  %v1347_v20 = vadd.f32 %v1346_v18, %v1276_v16 }
 0x8f8   :  { %v4256_v22 = vpop.f32.mrf.mxu0  ;;  %1363 = vrot.lane.b32.xlu0 %v4607_v19, %s4774_s17 }
 0x8f9   :  { %v1350_v38 = vadd.f32 %v5113_v50, %v1347_v20 }
 0x8fb   :  { %4610 = vtanh.f32 %v1350_v38  ;;  %v3846_v46 = vmul.f32 -1.442695, %v1350_v38 }
 0x8fc   :  { %4612 = vpow2.f32 %v3844_v40 }
 0x8fd   :  { %4614 = vpow2.f32 %v3845_v42 }
 0x8fe   :  { %4616 = vpow2.f32 %v3846_v46 }
 0x8ff   :  { %v4609_v12 = vpop.eup %4608 }
 0x900   :  { %1387 = vrot.lane.b32.xlu1 %v4609_v12, %s4774_s17 }
 0x908   :  { %v4611_v39 = vpop.eup %4610 }
 0x909   :  { %1411 = vrot.lane.b32.xlu0 %v4611_v39, %s4774_s17  ;;  %v4613_v43 = vpop.eup %4612 }
 0x90a   :  { %v1354_v47 = vadd.f32 1.0, %v4613_v43  ;;  %v4615_v48 = vpop.eup %4614 }
 0x90b   :  { %v1381_v4 = vadd.f32 1.0, %v4615_v48  ;;  %v4617_v51 = vpop.eup %4616 }
 0x90c   :  { %4618 = vrcp.f32 %v1354_v47  ;;  %v1405_v52 = vadd.f32 1.0, %v4617_v51 }
 0x90d   :  { %4620 = vrcp.f32 %v1381_v4 }
 0x90e   :  { %4622 = vrcp.f32 %v1405_v52 }
 0x919   :  { %v4619_v11 = vpop.eup %4618 }
 0x91a   :  { %v4621_v55 = vpop.eup %4620  ;;  %v1361_v62 = vmul.f32 %v4619_v11, %v1359_v61 }
 0x91b   :  { %v4623_v58 = vpop.eup %4622  ;;  %v1385_v3 = vmul.f32 %v4621_v55, %v5127_v45 }
 0x91c   :  { %v1409_v14 = vmul.f32 %v4623_v58, %v5131_v49 }
 0x96a   :  { %v1364_v53 = vpop.permute.xlu0 %1363 }
 0x96b   :  { %v1366_v54 = vmul.f32 %v4619_v11, %v1364_v53 }
 0x96d   :  { %1368 = vrot.lane.b32.xlu1 %v1366_v54, %s4775_s2 }
 0x972   :  { %v1388_v56 = vpop.permute.xlu1 %1387 }
 0x973   :  { %v1390_v57 = vmul.f32 %v4621_v55, %v1388_v56 }
 0x975   :  { %1392 = vrot.lane.b32.xlu0 %v1390_v57, %s4775_s2 }
 0x97b   :  { %v1412_v59 = vpop.permute.xlu0 %1411 }
 0x97c   :  { %v1414_v60 = vmul.f32 %v4623_v58, %v1412_v59 }
 0x97e   :  { %1416 = vrot.lane.b32.xlu1 %v1414_v60, %s4775_s2 }
 0x9df   :  { %v1369_v63 = vpop.permute.xlu1 %1368 }
 0x9e0   :  { %v5204_v1 = vadd.f32 %v1369_v63, %v1361_v62 }
 0x9e2   :  { %4624 = vtanh.f32 %v5204_v1 }
 0x9e7   :  { %v1393_v8 = vpop.permute.xlu0 %1392 }
 0x9e8   :  { %v5208_v9 = vadd.f32 %v1393_v8, %v1385_v3 }
 0x9ea   :  { %4626 = vtanh.f32 %v5208_v9 }
 0x9ef   :  { %v4625_v13 = vpop.eup %4624 }
 0x9f0   :  { %v1417_v15 = vpop.permute.xlu1 %1416  ;;  %1374 = vrot.lane.b32.xlu0 %v4625_v13, %s4774_s17 }
 0x9f1   :  { %v5213_v41 = vadd.f32 %v1417_v15, %v1409_v14 }
 0x9f3   :  { %4628 = vtanh.f32 %v5213_v41 }
 0x9f7   :  { %v4627_v16 = vpop.eup %4626 }
 0x9f8   :  { %1398 = vrot.lane.b32.xlu1 %v4627_v16, %s4774_s17 }
 0xa00   :  { %v4629_v17 = vpop.eup %4628 }
 0xa01   :  { %1422 = vrot.lane.b32.xlu0 %v4629_v17, %s4774_s17 }
 0xa62   :  { %v1375_v45 = vpop.permute.xlu0 %1374 }
 0xa63   :  { %v1377_v18 = vmul.f32 %v4619_v11, %v1375_v45  ;;  %v1803_v45 = vrot.slane %v5204_v1, 6 }
 0xa65   :  { %v1427_v19 = vrot.slane %v1377_v18, 6 }
 0xa67   :  { %1428 = vrot.lane.b32.xlu1 %v1427_v19, %s4775_s2 }
 0xa6a   :  { %v1399_v20 = vpop.permute.xlu1 %1398 }
 0xa6b   :  { %v1401_v49 = vmul.f32 %v4621_v55, %v1399_v20 }
 0xa6d   :  { %1504 = vrot.lane.b32.xlu0 %v1401_v49, %s4775_s2 }
 0xa73   :  { %v1423_v22 = vpop.permute.xlu0 %1422 }
 0xa74   :  { %v1425_v38 = vmul.f32 %v4623_v58, %v1423_v22 }
 0xa76   :  { %1650 = vrot.lane.b32.xlu1 %v1425_v38, %s4775_s2 }
 0xad9   :  { %v1429_v12 = vpop.permute.xlu1 %1428 }
 0xada   :  { %4266 = vmatmul.mubr.msk.f32.vlgmr.msra.gmra.mxu1 %vm155_vm2, %v1429_v12 }
 0xadb   :  { %4280 = vmatpush3.msra.mxu1 %v4952_v33  ;;  %4287 = vmatprep.mubr.msk.f32.mxu1 %vm4773_vm1, %v4772_v0 }
 0xadc   :  { %4281 = vmatprep.subr.mxu1 %v4772_v0 }
 0xadd   :  { %4282 = vmatpush3.msra.mxu1 %v4958_v35 }
 0xade   :  { %4283 = vmatprep.subr.mxu1 %v4772_v0 }
 0xadf   :  { %4284 = vmatpush3.msra.mxu1 %v4967_v36  ;;  %v1505_v39 = vpop.permute.xlu0 %1504 }
 0xae0   :  { %4277 = vmatmul.mubr.msk.f32.vlgmr.msra.gmra.mxu0 %vm155_vm2, %v1505_v39  ;;  %4285 = vmatprep.subr.mxu1 %v4772_v0 }
 0xae1   :  { %4286 = vmatpush3.msra.mxu1 %v4974_v37  ;;  %4291 = vmatpush3.msra.mxu0 %v5023_v21 }
 0xae2   :  { %4288 = vmatmul.mubr.msk.f32.vlgmr.msra.gmra.mxu1 %vm155_vm2, %v1429_v12  ;;  %4292 = vmatprep.subr.mxu0 %v4772_v0 }
 0xae3   :  { %4301 = vmatprep.subr.mxu1 %v4772_v0  ;;  %4293 = vmatpush3.msra.mxu0 %v5038_v24 }
 0xae4   :  { %4302 = vmatpush3.msra.mxu1 %v5031_v23  ;;  %4294 = vmatprep.subr.mxu0 %v4772_v0 }
 0xae5   :  { %4303 = vmatprep.subr.mxu1 %v4772_v0  ;;  %4295 = vmatpush3.msra.mxu0 %v5052_v26 }
 0xae6   :  { %4304 = vmatpush3.msra.mxu1 %v5045_v25  ;;  %4296 = vmatprep.subr.mxu0 %v4772_v0 }
 0xae7   :  { %4305 = vmatprep.subr.mxu1 %v4772_v0  ;;  %4297 = vmatpush3.msra.mxu0 %v5066_v32 }
 0xae8   :  { %4306 = vmatpush3.msra.mxu1 %v5059_v31  ;;  %v1651_v40 = vpop.permute.xlu1 %1650  ;;  %4298 = vmatprep.mubr.msk.f32.mxu0 %vm4773_vm1, %v4772_v0 }
 0xae9   :  { %4299 = vmatmul.mubr.msk.f32.vlgmr.msra.gmra.mxu0 %vm155_vm2, %v1651_v40  ;;  %4307 = vmatprep.subr.mxu1 %v4772_v0 }
 0xaea   :  { %4308 = vmatpush3.msra.mxu1 %v5073_v34  ;;  %4309 = vmatprep.mubr.msk.f32.mxu1 %vm4773_vm1, %v4772_v0 }
 0xaeb   :  { %4310 = vmatmul.mubr.msk.f32.vlgmr.msra.gmra.mxu1 %vm155_vm2, %v1505_v39  ;;  %4312 = vmatprep.subr.mxu0 %v4772_v0 }
 0xaec   :  { %4313 = vmatpush3.msra.mxu0 %v4848_v2  ;;  %4320 = vmatprep.mubr.msk.f32.mxu0 %vm4773_vm1, %v4772_v0 }
 0xaed   :  { %4314 = vmatprep.subr.mxu0 %v4772_v0  ;;  %4323 = vmatprep.subr.mxu1 %v4772_v0 }
 0xaee   :  { %4315 = vmatpush3.msra.mxu0 %v4862_v5  ;;  %4324 = vmatpush3.msra.mxu1 %v4912_v27 }
 0xaef   :  { %4316 = vmatprep.subr.mxu0 %v4772_v0  ;;  %4325 = vmatprep.subr.mxu1 %v4772_v0 }
 0xaf0   :  { %4317 = vmatpush3.msra.mxu0 %v4868_v6  ;;  %4326 = vmatpush3.msra.mxu1 %v4919_v28 }
 0xaf1   :  { %4318 = vmatprep.subr.mxu0 %v4772_v0  ;;  %4327 = vmatprep.subr.mxu1 %v4772_v0 }
 0xaf2   :  { %4319 = vmatpush3.msra.mxu0 %v4876_v7  ;;  %4328 = vmatpush3.msra.mxu1 %v4926_v29 }
 0xaf3   :  { %4334 = vmatprep.subr.mxu0 %v4772_v0  ;;  %4329 = vmatprep.subr.mxu1 %v4772_v0 }
 0xaf4   :  { %4330 = vmatpush3.msra.mxu1 %v4933_v30  ;;  %4331 = vmatprep.mubr.msk.f32.mxu1 %vm4773_vm1, %v4772_v0 }
 0xaf5   :  { %4345 = vmatprep.subr.mxu1 %v4772_v0 }
 0xb9a   :  { %v1498_v2 = vpop.f32.mrf.mxu1 }
 0xb9b   :  { %v1502_v5 = vadd.f32 %v1498_v2, %v4898_v10 }
 0xb9c   :  { %v4267_v6 = vpop.f32.mrf.mxu1 }
 0xb9d   :  { %4630 = vtanh.f32 %v1502_v5  ;;  %v3852_v54 = vmul.f32 -1.442695, %v1502_v5 }
 0xba0   :  { %v1574_v27 = vpop.f32.mrf.mxu0 }
 0xba2   :  { %v4278_v7 = vpop.f32.mrf.mxu0  ;;  %v1644_v28 = vpop.f32.mrf.mxu1 }
 0xba3   :  { %v1645_v29 = vadd.f32 %v1644_v28, %v1574_v27 }
 0xba4   :  { %v4289_v42 = vpop.f32.mrf.mxu1 }
 0xba5   :  { %v1648_v43 = vadd.f32 %v4995_v44, %v1645_v29 }
 0xba7   :  { %4632 = vtanh.f32 %v1648_v43  ;;  %v3853_v44 = vmul.f32 -1.442695, %v1648_v43 }
 0xba9   :  { %v1720_v46 = vpop.f32.mrf.mxu0 }
 0xbaa   :  { %v4631_v30 = vpop.eup %4630 }
 0xbab   :  { %v4300_v47 = vpop.f32.mrf.mxu0  ;;  %v1790_v48 = vpop.f32.mrf.mxu1  ;;  %1807 = vrot.lane.b32.xlu0 %v4631_v30, %s4774_s17 }
 0xbac   :  { %v1791_v4 = vadd.f32 %v1790_v48, %v1720_v46 }
 0xbad   :  { %v4311_v51 = vpop.f32.mrf.mxu1 }
 0xbae   :  { %v1794_v11 = vadd.f32 %v5113_v50, %v1791_v4  ;;  %v5402_v51 = vld [vmem:[%s5748_s6] ss:$0 sm:$0xff] }
 0xbb0   :  { %4634 = vtanh.f32 %v1794_v11  ;;  %v3854_v56 = vmul.f32 -1.442695, %v1794_v11 }
 0xbb1   :  { %4636 = vpow2.f32 %v3852_v54 }
 0xbb2   :  { %4638 = vpow2.f32 %v3853_v44 }
 0xbb3   :  { %4640 = vpow2.f32 %v3854_v56 }
 0xbb4   :  { %v4633_v52 = vpop.eup %4632 }
 0xbb5   :  { %1831 = vrot.lane.b32.xlu1 %v4633_v52, %s4774_s17 }
 0xbbd   :  { %v4635_v53 = vpop.eup %4634 }
 0xbbe   :  { %1855 = vrot.lane.b32.xlu0 %v4635_v53, %s4774_s17  ;;  %v4637_v55 = vpop.eup %4636 }
 0xbbf   :  { %v1798_v57 = vadd.f32 1.0, %v4637_v55  ;;  %v4639_v58 = vpop.eup %4638 }
 0xbc0   :  { %v1825_v59 = vadd.f32 1.0, %v4639_v58  ;;  %v4641_v60 = vpop.eup %4640 }
 0xbc1   :  { %4642 = vrcp.f32 %v1798_v57  ;;  %v1849_v3 = vadd.f32 1.0, %v4641_v60 }
 0xbc2   :  { %4644 = vrcp.f32 %v1825_v59 }
 0xbc3   :  { %4646 = vrcp.f32 %v1849_v3 }
 0xbce   :  { %v4643_v61 = vpop.eup %4642 }
 0xbcf   :  { %v4645_v8 = vpop.eup %4644  ;;  %v1805_v18 = vmul.f32 %v4643_v61, %v1803_v45 }
 0xbd0   :  { %v4647_v15 = vpop.eup %4646  ;;  %v1829_v49 = vmul.f32 %v4645_v8, %v5208_v9 }
 0xbd1   :  { %v1853_v39 = vmul.f32 %v4647_v15, %v5213_v41 }
 0xc1d   :  { %v1808_v62 = vpop.permute.xlu0 %1807 }
 0xc1e   :  { %v1810_v63 = vmul.f32 %v4643_v61, %v1808_v62 }
 0xc20   :  { %1812 = vrot.lane.b32.xlu1 %v1810_v63, %s4775_s2 }
 0xc27   :  { %v1832_v13 = vpop.permute.xlu1 %1831 }
 0xc28   :  { %v1834_v14 = vmul.f32 %v4645_v8, %v1832_v13 }
 0xc2a   :  { %1836 = vrot.lane.b32.xlu0 %v1834_v14, %s4775_s2 }
 0xc30   :  { %v1856_v16 = vpop.permute.xlu0 %1855 }
 0xc31   :  { %v1858_v17 = vmul.f32 %v4647_v15, %v1856_v16 }
 0xc33   :  { %1860 = vrot.lane.b32.xlu1 %v1858_v17, %s4775_s2 }
 0xc92   :  { %v1813_v19 = vpop.permute.xlu1 %1812 }
 0xc93   :  { %v5286_v20 = vadd.f32 %v1813_v19, %v1805_v18 }
 0xc95   :  { %4648 = vtanh.f32 %v5286_v20 }
 0xc9c   :  { %v1837_v22 = vpop.permute.xlu0 %1836 }
 0xc9d   :  { %v5290_v38 = vadd.f32 %v1837_v22, %v1829_v49 }
 0xc9f   :  { %4650 = vtanh.f32 %v5290_v38 }
 0xca2   :  { %v4649_v12 = vpop.eup %4648 }
 0xca3   :  { %1818 = vrot.lane.b32.xlu0 %v4649_v12, %s4774_s17 }
 0xca5   :  { %v1861_v40 = vpop.permute.xlu1 %1860 }
 0xca6   :  { %v5295_v1 = vadd.f32 %v1861_v40, %v1853_v39  ;;  %v2249_v39 = vrot.slane %v5286_v20, 6 }
 0xca8   :  { %4652 = vtanh.f32 %v5295_v1 }
 0xcac   :  { %v4651_v2 = vpop.eup %4650 }
 0xcad   :  { %1842 = vrot.lane.b32.xlu1 %v4651_v2, %s4774_s17 }
 0xcb5   :  { %v4653_v5 = vpop.eup %4652 }
 0xcb6   :  { %1866 = vrot.lane.b32.xlu0 %v4653_v5, %s4774_s17 }
 0xd15   :  { %v1819_v9 = vpop.permute.xlu0 %1818 }
 0xd16   :  { %v1821_v6 = vmul.f32 %v4643_v61, %v1819_v9 }
 0xd18   :  { %1871 = vrot.lane.b32.xlu1 %v1821_v6, %s4775_s2 }
 0xd1f   :  { %v1843_v27 = vpop.permute.xlu1 %1842 }
 0xd20   :  { %v1845_v7 = vmul.f32 %v4645_v8, %v1843_v27 }
 0xd22   :  { %1950 = vrot.lane.b32.xlu0 %v1845_v7, %s4775_s2 }
 0xd28   :  { %v1867_v41 = vpop.permute.xlu0 %1866 }
 0xd29   :  { %v1869_v28 = vmul.f32 %v4647_v15, %v1867_v41 }
 0xd2b   :  { %2096 = vrot.lane.b32.xlu1 %v1869_v28, %s4775_s2 }
 0xd8a   :  { %v1872_v29 = vpop.permute.xlu1 %1871 }
 0xd8b   :  { %4321 = vmatmul.mubr.msk.f32.vlgmr.msra.gmra.mxu0 %vm155_vm2, %v1872_v29 }
 0xd8c   :  { %4335 = vmatpush3.msra.mxu0 %v4952_v33  ;;  %4342 = vmatprep.mubr.msk.f32.mxu0 %vm4773_vm1, %v4772_v0 }
 0xd8d   :  { %4336 = vmatprep.subr.mxu0 %v4772_v0 }
 0xd8e   :  { %4337 = vmatpush3.msra.mxu0 %v4958_v35 }
 0xd8f   :  { %4338 = vmatprep.subr.mxu0 %v4772_v0 }
 0xd90   :  { %4339 = vmatpush3.msra.mxu0 %v4967_v36  ;;  %v5341_v36 = vld [vmem:[%s5746_s5 + $0x18] sm:$0xff] }
 0xd91   :  { %4340 = vmatprep.subr.mxu0 %v4772_v0 }
 0xd92   :  { %4341 = vmatpush3.msra.mxu0 %v4974_v37  ;;  %v5347_v37 = vld [vmem:[%s5743_s3 + $0x18] sm:$0xff] }
 0xd93   :  { %4343 = vmatmul.mubr.msk.f32.vlgmr.msra.gmra.mxu0 %vm155_vm2, %v1872_v29  ;;  %4356 = vmatprep.subr.mxu0 %v4772_v0 }
 0xd94   :  { %4357 = vmatpush3.msra.mxu0 %v5031_v23  ;;  %v1951_v33 = vpop.permute.xlu0 %1950  ;;  %4364 = vmatprep.mubr.msk.f32.mxu0 %vm4773_vm1, %v4772_v0  ;;  %v5363_v23 = vld [vmem:[%s5746_s5 + $0x10] sm:$0xff] }
 0xd95   :  { %4332 = vmatmul.mubr.msk.f32.vlgmr.msra.gmra.mxu1 %vm155_vm2, %v1951_v33  ;;  %4358 = vmatprep.subr.mxu0 %v4772_v0 }
 0xd96   :  { %4346 = vmatpush3.msra.mxu1 %v5023_v21  ;;  %4359 = vmatpush3.msra.mxu0 %v5045_v25  ;;  %v5357_v21 = vld [vmem:[%s5743_s3 + $0x10] sm:$0xff]  ;;  %v5377_v25 = vld [vmem:[%s5746_s5 + $0x8] sm:$0xff] }
 0xd97   :  { %4347 = vmatprep.subr.mxu1 %v4772_v0  ;;  %4360 = vmatprep.subr.mxu0 %v4772_v0 }
 0xd98   :  { %4348 = vmatpush3.msra.mxu1 %v5038_v24  ;;  %4361 = vmatpush3.msra.mxu0 %v5059_v31  ;;  %v5371_v24 = vld [vmem:[%s5743_s3 + $0x8] sm:$0xff]  ;;  %v5391_v31 = vld [vmem:[%s5746_s5] sm:$0xff] }
 0xd99   :  { %4349 = vmatprep.subr.mxu1 %v4772_v0  ;;  %4362 = vmatprep.subr.mxu0 %v4772_v0 }
 0xd9a   :  { %4350 = vmatpush3.msra.mxu1 %v5052_v26  ;;  %4363 = vmatpush3.msra.mxu0 %v5073_v34  ;;  %v5385_v26 = vld [vmem:[%s5743_s3] sm:$0xff] }
 0xd9b   :  { %4351 = vmatprep.subr.mxu1 %v4772_v0  ;;  %4365 = vmatmul.mubr.msk.f32.vlgmr.msra.gmra.mxu0 %vm155_vm2, %v1951_v33 }
 0xd9c   :  { %4352 = vmatpush3.msra.mxu1 %v5066_v32  ;;  %4353 = vmatprep.mubr.msk.f32.mxu1 %vm4773_vm1, %v4772_v0 }
 0xd9d   :  { %v2097_v35 = vpop.permute.xlu1 %2096  ;;  %4367 = vmatprep.subr.mxu1 %v4772_v0  ;;  %4378 = vmatprep.subr.mxu0 %v4772_v0 }
 0xd9e   :  { %4354 = vmatmul.mubr.msk.f32.vlgmr.msra.gmra.mxu1 %vm155_vm2, %v2097_v35  ;;  %4379 = vmatpush3.msra.mxu0 %v5341_v36 }
 0xd9f   :  { %4368 = vmatpush3.msra.mxu1 %v5347_v37  ;;  %4375 = vmatprep.mubr.msk.f32.mxu1 %vm4773_vm1, %v4772_v0 }
 0xda0   :  { %4369 = vmatprep.subr.mxu1 %v4772_v0  ;;  %4380 = vmatprep.subr.mxu0 %v4772_v0 }
 0xda1   :  { %4370 = vmatpush3.msra.mxu1 %v5357_v21  ;;  %4381 = vmatpush3.msra.mxu0 %v5363_v23 }
 0xda2   :  { %4371 = vmatprep.subr.mxu1 %v4772_v0  ;;  %4382 = vmatprep.subr.mxu0 %v4772_v0 }
 0xda3   :  { %4372 = vmatpush3.msra.mxu1 %v5371_v24  ;;  %4383 = vmatpush3.msra.mxu0 %v5377_v25 }
 0xda4   :  { %4373 = vmatprep.subr.mxu1 %v4772_v0  ;;  %4384 = vmatprep.subr.mxu0 %v4772_v0 }
 0xda5   :  { %4374 = vmatpush3.msra.mxu1 %v5385_v26  ;;  %4385 = vmatpush3.msra.mxu0 %v5391_v31 }
 0xda6   :  { %4389 = vmatprep.subr.mxu1 %v4772_v0  ;;  %4386 = vmatprep.mubr.msk.f32.mxu0 %vm4773_vm1, %v4772_v0 }
 0xda7   :  { %4400 = vmatprep.subr.mxu0 %v4772_v0 }
 0xe4b   :  { %v1941_v32 = vpop.f32.mrf.mxu0 }
 0xe4c   :  { %v1946_v34 = vrot.slane %v1941_v32, 6 }
 0xe4d   :  { %v4322_v42 = vpop.f32.mrf.mxu0 }
 0xe4e   :  { %v1948_v43 = vadd.f32 %v1946_v34, %v4898_v10 }
 0xe50   :  { %4654 = vtanh.f32 %v1948_v43  ;;  %v3860_v60 = vmul.f32 -1.442695, %v1948_v43 }
 0xe53   :  { %v2090_v46 = vpop.f32.mrf.mxu0 }
 0xe55   :  { %v2020_v30 = vpop.f32.mrf.mxu1  ;;  %v4344_v47 = vpop.f32.mrf.mxu0 }
 0xe56   :  { %v2091_v48 = vadd.f32 %v2090_v46, %v2020_v30  ;;  %v5434_v30 = vld [vmem:[%s5747_s4 + $0x18] sm:$0xff]  ;;  %v5443_v47 = vld [vmem:[%s5747_s4 + $0x10] sm:$0xff] }
 0xe57   :  { %v4333_v4 = vpop.f32.mrf.mxu1 }
 0xe58   :  { %v2094_v11 = vadd.f32 %v5402_v51, %v2091_v48  ;;  %v5450_v48 = vld [vmem:[%s5747_s4 + $0x8] sm:$0xff]  ;;  %v5457_v4 = vld [vmem:[%s5747_s4] sm:$0xff] }
 0xe5a   :  { %4656 = vtanh.f32 %v2094_v11  ;;  %v3861_v61 = vmul.f32 -1.442695, %v2094_v11 }
 0xe5b   :  { %v2236_v52 = vpop.f32.mrf.mxu0 }
 0xe5d   :  { %v4655_v53 = vpop.eup %4654  ;;  %v4366_v54 = vpop.f32.mrf.mxu0 }
 0xe5e   :  { %v2166_v44 = vpop.f32.mrf.mxu1  ;;  %2253 = vrot.lane.b32.xlu0 %v4655_v53, %s4774_s17  ;;  %v5472_v53 = vld [vmem:[%s5750_s7 + $0x18] sm:$0xff]  ;;  %v5480_v54 = vld [vmem:[%s5749_s8 + $0x10] sm:$0xff] }
 0xe5f   :  { %v2237_v55 = vadd.f32 %v2236_v52, %v2166_v44  ;;  %v5466_v52 = vld [vmem:[%s5749_s8 + $0x18] sm:$0xff]  ;;  %v5486_v44 = vld [vmem:[%s5750_s7 + $0x10] sm:$0xff] }
 0xe60   :  { %v4355_v56 = vpop.f32.mrf.mxu1 }
 0xe61   :  { %v2240_v57 = vadd.f32 %v5113_v50, %v2237_v55  ;;  %v5494_v55 = vld [vmem:[%s5749_s8 + $0x8] sm:$0xff] }
 0xe62   :  { %v5500_v56 = vld [vmem:[%s5750_s7 + $0x8] sm:$0xff] }
 0xe63   :  { %4658 = vtanh.f32 %v2240_v57  ;;  %v3862_v63 = vmul.f32 -1.442695, %v2240_v57  ;;  %v5510_v57 = vld [vmem:[%s5750_s7] sm:$0xff] }
 0xe64   :  { %4660 = vpow2.f32 %v3860_v60 }
 0xe65   :  { %4662 = vpow2.f32 %v3861_v61 }
 0xe66   :  { %4664 = vpow2.f32 %v3862_v63 }
 0xe67   :  { %v4657_v58 = vpop.eup %4656 }
 0xe68   :  { %2277 = vrot.lane.b32.xlu1 %v4657_v58, %s4774_s17 }
 0xe70   :  { %v4659_v59 = vpop.eup %4658 }
 0xe71   :  { %2301 = vrot.lane.b32.xlu0 %v4659_v59, %s4774_s17  ;;  %v4661_v62 = vpop.eup %4660  ;;  %v5516_v59 = vld [vmem:[%s5749_s8] sm:$0xff] }
 0xe72   :  { %v2244_v3 = vadd.f32 1.0, %v4661_v62  ;;  %v4663_v8 = vpop.eup %4662 }
 0xe73   :  { %v2271_v13 = vadd.f32 1.0, %v4663_v8  ;;  %v4665_v50 = vpop.eup %4664 }
 0xe74   :  { %4666 = vrcp.f32 %v2244_v3  ;;  %v2295_v17 = vadd.f32 1.0, %v4665_v50 }
 0xe75   :  { %4668 = vrcp.f32 %v2271_v13 }
 0xe76   :  { %4670 = vrcp.f32 %v2295_v17 }
 0xe81   :  { %v4667_v14 = vpop.eup %4666 }
 0xe82   :  { %v4669_v45 = vpop.eup %4668  ;;  %v2251_v40 = vmul.f32 %v4667_v14, %v2249_v39 }
 0xe83   :  { %v4671_v49 = vpop.eup %4670  ;;  %v2275_v9 = vmul.f32 %v4669_v45, %v5290_v38 }
 0xe84   :  { %v2299_v41 = vmul.f32 %v4671_v49, %v5295_v1 }
 0xed0   :  { %v2254_v15 = vpop.permute.xlu0 %2253 }
 0xed1   :  { %v2256_v16 = vmul.f32 %v4667_v14, %v2254_v15 }
 0xed3   :  { %2258 = vrot.lane.b32.xlu1 %v2256_v16, %s4775_s2 }
 0xeda   :  { %v2278_v18 = vpop.permute.xlu1 %2277 }
 0xedb   :  { %v2280_v19 = vmul.f32 %v4669_v45, %v2278_v18 }
 0xedd   :  { %2282 = vrot.lane.b32.xlu0 %v2280_v19, %s4775_s2 }
 0xee3   :  { %v2302_v22 = vpop.permute.xlu0 %2301 }
 0xee4   :  { %v2304_v12 = vmul.f32 %v4671_v49, %v2302_v22 }
 0xee6   :  { %2306 = vrot.lane.b32.xlu1 %v2304_v12, %s4775_s2 }
 0xf45   :  { %v2259_v2 = vpop.permute.xlu1 %2258 }
 0xf46   :  { %v5413_v5 = vadd.f32 %v2259_v2, %v2251_v40 }
 0xf48   :  { %4672 = vtanh.f32 %v5413_v5 }
 0xf4f   :  { %v2283_v6 = vpop.permute.xlu0 %2282 }
 0xf50   :  { %v5417_v27 = vadd.f32 %v2283_v6, %v2275_v9 }
 0xf52   :  { %4674 = vtanh.f32 %v5417_v27 }
 0xf55   :  { %v4673_v7 = vpop.eup %4672 }
 0xf56   :  { %2264 = vrot.lane.b32.xlu0 %v4673_v7, %s4774_s17 }
 0xf58   :  { %v2307_v28 = vpop.permute.xlu1 %2306 }
 0xf59   :  { %v5422_v20 = vadd.f32 %v2307_v28, %v2299_v41 }
 0xf5b   :  { %4676 = vtanh.f32 %v5422_v20 }
 0xf5f   :  { %v4675_v29 = vpop.eup %4674 }
 0xf60   :  { %2288 = vrot.lane.b32.xlu1 %v4675_v29, %s4774_s17 }
 0xf68   :  { %v4677_v33 = vpop.eup %4676 }
 0xf69   :  { %2312 = vrot.lane.b32.xlu0 %v4677_v33, %s4774_s17 }
 0xfc8   :  { %v2265_v38 = vpop.permute.xlu0 %2264 }
 0xfc9   :  { %v2267_v35 = vmul.f32 %v4667_v14, %v2265_v38 }
 0xfcb   :  { %v2317_v32 = vrot.slane %v2267_v35, 2 }
 0xfcd   :  { %2318 = vrot.lane.b32.xlu1 %v2317_v32, %s4775_s2 }
 0xfd2   :  { %v2289_v34 = vpop.permute.xlu1 %2288 }
 0xfd3   :  { %v2291_v42 = vmul.f32 %v4669_v45, %v2289_v34  ;;  %v5551_v45 = vld [vmem:[%s5751_s9] ss:$0 sm:$0xff] }
 0xfd5   :  { %2397 = vrot.lane.b32.xlu0 %v2291_v42, %s4775_s2 }
 0xfdb   :  { %v2313_v1 = vpop.permute.xlu0 %2312 }
 0xfdc   :  { %v2315_v43 = vmul.f32 %v4671_v49, %v2313_v1 }
 0xfde   :  { %2543 = vrot.lane.b32.xlu1 %v2315_v43, %s4775_s2  ;;  %v2696_v43 = vrot.slane %v5413_v5, 6 }
0x103f   :  { %v2319_v46 = vpop.permute.xlu1 %2318 }
0x1040   :  { %4376 = vmatmul.mubr.msk.f32.vlgmr.msra.gmra.mxu1 %vm155_vm2, %v2319_v46 }
0x1041   :  { %4390 = vmatpush3.msra.mxu1 %v5434_v30  ;;  %4397 = vmatprep.mubr.msk.f32.mxu1 %vm4773_vm1, %v4772_v0 }
0x1042   :  { %4391 = vmatprep.subr.mxu1 %v4772_v0 }
0x1043   :  { %4392 = vmatpush3.msra.mxu1 %v5443_v47 }
0x1044   :  { %4393 = vmatprep.subr.mxu1 %v4772_v0 }
0x1045   :  { %4394 = vmatpush3.msra.mxu1 %v5450_v48 }
0x1046   :  { %4395 = vmatprep.subr.mxu1 %v4772_v0 }
0x1047   :  { %4396 = vmatpush3.msra.mxu1 %v5457_v4  ;;  %v2398_v11 = vpop.permute.xlu0 %2397 }
0x1048   :  { %4387 = vmatmul.mubr.msk.f32.vlgmr.msra.gmra.mxu0 %vm155_vm2, %v2398_v11  ;;  %4398 = vmatmul.mubr.msk.f32.vlgmr.msra.gmra.mxu1 %vm155_vm2, %v2319_v46 }
0x1049   :  { %4411 = vmatprep.subr.mxu1 %v4772_v0  ;;  %4401 = vmatpush3.msra.mxu0 %v5466_v52 }
0x104a   :  { %4412 = vmatpush3.msra.mxu1 %v5472_v53  ;;  %4402 = vmatprep.subr.mxu0 %v4772_v0 }
0x104b   :  { %4413 = vmatprep.subr.mxu1 %v4772_v0  ;;  %4403 = vmatpush3.msra.mxu0 %v5480_v54 }
0x104c   :  { %4414 = vmatpush3.msra.mxu1 %v5486_v44  ;;  %4404 = vmatprep.subr.mxu0 %v4772_v0 }
0x104d   :  { %4415 = vmatprep.subr.mxu1 %v4772_v0  ;;  %4405 = vmatpush3.msra.mxu0 %v5494_v55 }
0x104e   :  { %4416 = vmatpush3.msra.mxu1 %v5500_v56  ;;  %4406 = vmatprep.subr.mxu0 %v4772_v0 }
0x104f   :  { %4417 = vmatprep.subr.mxu1 %v4772_v0  ;;  %4419 = vmatprep.mubr.msk.f32.mxu1 %vm4773_vm1, %v4772_v0 }
0x1050   :  { %4418 = vmatpush3.msra.mxu1 %v5510_v57  ;;  %v2544_v58 = vpop.permute.xlu1 %2543  ;;  %4407 = vmatpush3.msra.mxu0 %v5516_v59 }
0x1051   :  { %4408 = vmatprep.mubr.msk.f32.mxu0 %vm4773_vm1, %v4772_v0  ;;  %4420 = vmatmul.mubr.msk.f32.vlgmr.msra.gmra.mxu1 %vm155_vm2, %v2398_v11 }
0x1052   :  { %4409 = vmatmul.mubr.msk.f32.vlgmr.msra.gmra.mxu0 %vm155_vm2, %v2544_v58  ;;  %4422 = vmatprep.subr.mxu0 %v4772_v0 }
0x1053   :  { %4423 = vmatpush3.msra.mxu0 %v5347_v37  ;;  %4433 = vmatprep.subr.mxu1 %v4772_v0 }
0x1054   :  { %4424 = vmatprep.subr.mxu0 %v4772_v0  ;;  %4434 = vmatpush3.msra.mxu1 %v5341_v36 }
0x1055   :  { %4425 = vmatpush3.msra.mxu0 %v5357_v21  ;;  %4430 = vmatprep.mubr.msk.f32.mxu0 %vm4773_vm1, %v4772_v0 }
0x1056   :  { %4426 = vmatprep.subr.mxu0 %v4772_v0  ;;  %4435 = vmatprep.subr.mxu1 %v4772_v0 }
0x1057   :  { %4427 = vmatpush3.msra.mxu0 %v5371_v24  ;;  %4436 = vmatpush3.msra.mxu1 %v5363_v23 }
0x1058   :  { %4428 = vmatprep.subr.mxu0 %v4772_v0  ;;  %4437 = vmatprep.subr.mxu1 %v4772_v0 }
0x1059   :  { %4429 = vmatpush3.msra.mxu0 %v5385_v26  ;;  %4438 = vmatpush3.msra.mxu1 %v5377_v25 }
0x105a   :  { %4444 = vmatprep.subr.mxu0 %v4772_v0  ;;  %4439 = vmatprep.subr.mxu1 %v4772_v0 }
0x105b   :  { %4440 = vmatpush3.msra.mxu1 %v5391_v31  ;;  %4441 = vmatprep.mubr.msk.f32.mxu1 %vm4773_vm1, %v4772_v0 }
0x105c   :  { %4455 = vmatprep.subr.mxu1 %v4772_v0 }
0x1100   :  { %v2388_v37 = vpop.f32.mrf.mxu1 }
0x1101   :  { %v2393_v21 = vrot.slane %v2388_v37, 4 }
0x1102   :  { %v4377_v24 = vpop.f32.mrf.mxu1 }
0x1103   :  { %v2395_v60 = vadd.f32 %v2393_v21, %v4898_v10 }
0x1105   :  { %4678 = vtanh.f32 %v2395_v60  ;;  %v3868_v22 = vmul.f32 -1.442695, %v2395_v60 }
0x1108   :  { %v2467_v26 = vpop.f32.mrf.mxu0  ;;  %v2537_v61 = vpop.f32.mrf.mxu1 }
0x1109   :  { %v2538_v62 = vadd.f32 %v2537_v61, %v2467_v26 }
0x110a   :  { %v4388_v63 = vpop.f32.mrf.mxu0  ;;  %v4399_v3 = vpop.f32.mrf.mxu1 }
0x110b   :  { %v2541_v8 = vadd.f32 %v5402_v51, %v2538_v62 }
0x110d   :  { %4680 = vtanh.f32 %v2541_v8  ;;  %v3869_v12 = vmul.f32 -1.442695, %v2541_v8 }
0x1111   :  { %v2683_v13 = vpop.f32.mrf.mxu1 }
0x1112   :  { %v4679_v50 = vpop.eup %4678  ;;  %v2613_v14 = vpop.f32.mrf.mxu0 }
0x1113   :  { %v2684_v15 = vadd.f32 %v2683_v13, %v2613_v14  ;;  %v4421_v16 = vpop.f32.mrf.mxu1  ;;  %2700 = vrot.lane.b32.xlu0 %v4679_v50, %s4774_s17 }
0x1114   :  { %v4410_v17 = vpop.f32.mrf.mxu0 }
0x1115   :  { %v2687_v18 = vadd.f32 %v5551_v45, %v2684_v15 }
0x1117   :  { %4682 = vtanh.f32 %v2687_v18  ;;  %v3870_v40 = vmul.f32 -1.442695, %v2687_v18 }
0x1118   :  { %4684 = vpow2.f32 %v3868_v22 }
0x1119   :  { %4686 = vpow2.f32 %v3869_v12 }
0x111a   :  { %v4681_v19 = vpop.eup %4680  ;;  %4688 = vpow2.f32 %v3870_v40 }
0x111b   :  { %2724 = vrot.lane.b32.xlu1 %v4681_v19, %s4774_s17 }
0x1124   :  { %v4683_v49 = vpop.eup %4682 }
0x1125   :  { %2748 = vrot.lane.b32.xlu0 %v4683_v49, %s4774_s17  ;;  %v4685_v39 = vpop.eup %4684 }
0x1126   :  { %v2691_v2 = vadd.f32 1.0, %v4685_v39  ;;  %v4687_v9 = vpop.eup %4686 }
0x1127   :  { %v2718_v6 = vadd.f32 1.0, %v4687_v9  ;;  %v4689_v7 = vpop.eup %4688 }
0x1128   :  { %4690 = vrcp.f32 %v2691_v2  ;;  %v2742_v33 = vadd.f32 1.0, %v4689_v7 }
0x1129   :  { %4692 = vrcp.f32 %v2718_v6 }
0x112a   :  { %4694 = vrcp.f32 %v2742_v33 }
0x1135   :  { %v4691_v41 = vpop.eup %4690 }
0x1136   :  { %v4693_v38 = vpop.eup %4692  ;;  %v2698_v46 = vmul.f32 %v4691_v41, %v2696_v43 }
0x1137   :  { %v4695_v34 = vpop.eup %4694  ;;  %v2722_v37 = vmul.f32 %v4693_v38, %v5417_v27 }
0x1138   :  { %v2746_v26 = vmul.f32 %v4695_v34, %v5422_v20 }
0x1185   :  { %v2701_v28 = vpop.permute.xlu0 %2700 }
0x1186   :  { %v2703_v29 = vmul.f32 %v4691_v41, %v2701_v28 }
0x1188   :  { %2705 = vrot.lane.b32.xlu1 %v2703_v29, %s4775_s2 }
0x118d   :  { %v2725_v35 = vpop.permute.xlu1 %2724 }
0x118e   :  { %v2727_v32 = vmul.f32 %v4693_v38, %v2725_v35 }
0x1190   :  { %2729 = vrot.lane.b32.xlu0 %v2727_v32, %s4775_s2 }
0x1197   :  { %v2749_v42 = vpop.permute.xlu0 %2748 }
0x1198   :  { %v2751_v1 = vmul.f32 %v4695_v34, %v2749_v42 }
0x119a   :  { %2753 = vrot.lane.b32.xlu1 %v2751_v1, %s4775_s2 }
0x11fa   :  { %v2706_v11 = vpop.permute.xlu1 %2705 }
0x11fb   :  { %v5560_v58 = vadd.f32 %v2706_v11, %v2698_v46 }
0x11fd   :  { %4696 = vtanh.f32 %v5560_v58 }
0x1202   :  { %v2730_v21 = vpop.permute.xlu0 %2729 }
0x1203   :  { %v5564_v24 = vadd.f32 %v2730_v21, %v2722_v37 }
0x1205   :  { %4698 = vtanh.f32 %v5564_v24 }
0x120a   :  { %v4697_v60 = vpop.eup %4696 }
0x120b   :  { %2711 = vrot.lane.b32.xlu0 %v4697_v60, %s4774_s17 }
0x120c   :  { %v2754_v61 = vpop.permute.xlu1 %2753 }
0x120d   :  { %v5569_v5 = vadd.f32 %v2754_v61, %v2746_v26  ;;  %v3143_v61 = vrot.slane %v5560_v58, 6 }
0x120f   :  { %4700 = vtanh.f32 %v5569_v5 }
0x1212   :  { %v4699_v62 = vpop.eup %4698 }
0x1213   :  { %2735 = vrot.lane.b32.xlu1 %v4699_v62, %s4774_s17 }
0x121c   :  { %v4701_v63 = vpop.eup %4700 }
0x121d   :  { %2759 = vrot.lane.b32.xlu0 %v4701_v63, %s4774_s17 }
0x127d   :  { %v2712_v27 = vpop.permute.xlu0 %2711 }
0x127e   :  { %v2714_v3 = vmul.f32 %v4691_v41, %v2712_v27 }
0x1280   :  { %v2764_v8 = vrot.slane %v2714_v3, 4 }
0x1282   :  { %2765 = vrot.lane.b32.xlu1 %v2764_v8, %s4775_s2 }
0x1285   :  { %v2736_v13 = vpop.permute.xlu1 %2735 }
0x1286   :  { %v2738_v50 = vmul.f32 %v4693_v38, %v2736_v13 }
0x1288   :  { %2844 = vrot.lane.b32.xlu0 %v2738_v50, %s4775_s2 }
0x128f   :  { %v2760_v20 = vpop.permute.xlu0 %2759 }
0x1290   :  { %v2762_v14 = vmul.f32 %v4695_v34, %v2760_v20 }
0x1292   :  { %2990 = vrot.lane.b32.xlu1 %v2762_v14, %s4775_s2 }
0x12f4   :  { %v2766_v15 = vpop.permute.xlu1 %2765 }
0x12f5   :  { %4431 = vmatmul.mubr.msk.f32.vlgmr.msra.gmra.mxu0 %vm155_vm2, %v2766_v15 }
0x12f6   :  { %4445 = vmatpush3.msra.mxu0 %v5434_v30  ;;  %4452 = vmatprep.mubr.msk.f32.mxu0 %vm4773_vm1, %v4772_v0 }
0x12f7   :  { %4446 = vmatprep.subr.mxu0 %v4772_v0 }
0x12f8   :  { %4447 = vmatpush3.msra.mxu0 %v5443_v47 }
0x12f9   :  { %4448 = vmatprep.subr.mxu0 %v4772_v0 }
0x12fa   :  { %4449 = vmatpush3.msra.mxu0 %v5450_v48  ;;  %v2845_v16 = vpop.permute.xlu0 %2844 }
0x12fb   :  { %4442 = vmatmul.mubr.msk.f32.vlgmr.msra.gmra.mxu1 %vm155_vm2, %v2845_v16  ;;  %4450 = vmatprep.subr.mxu0 %v4772_v0 }
0x12fc   :  { %4451 = vmatpush3.msra.mxu0 %v5457_v4  ;;  %4456 = vmatpush3.msra.mxu1 %v5466_v52 }
0x12fd   :  { %4453 = vmatmul.mubr.msk.f32.vlgmr.msra.gmra.mxu0 %vm155_vm2, %v2766_v15  ;;  %4457 = vmatprep.subr.mxu1 %v4772_v0 }
0x12fe   :  { %4466 = vmatprep.subr.mxu0 %v4772_v0  ;;  %4458 = vmatpush3.msra.mxu1 %v5480_v54 }
0x12ff   :  { %4467 = vmatpush3.msra.mxu0 %v5472_v53  ;;  %4459 = vmatprep.subr.mxu1 %v4772_v0 }
0x1300   :  { %4468 = vmatprep.subr.mxu0 %v4772_v0  ;;  %4460 = vmatpush3.msra.mxu1 %v5494_v55 }
0x1301   :  { %4469 = vmatpush3.msra.mxu0 %v5486_v44  ;;  %4461 = vmatprep.subr.mxu1 %v4772_v0 }
0x1302   :  { %4470 = vmatprep.subr.mxu0 %v4772_v0  ;;  %4462 = vmatpush3.msra.mxu1 %v5516_v59 }
0x1303   :  { %4471 = vmatpush3.msra.mxu0 %v5500_v56  ;;  %4463 = vmatprep.mubr.msk.f32.mxu1 %vm4773_vm1, %v4772_v0 }
0x1304   :  { %4472 = vmatprep.subr.mxu0 %v4772_v0  ;;  %4474 = vmatprep.mubr.msk.f32.mxu0 %vm4773_vm1, %v4772_v0  ;;  %v2991_v17 = vpop.permute.xlu1 %2990 }
0x1305   :  { %4473 = vmatpush3.msra.mxu0 %v5510_v57  ;;  %4477 = vmatprep.subr.mxu1 %v4772_v0 }
0x1306   :  { %4464 = vmatmul.mubr.msk.f32.vlgmr.msra.gmra.mxu1 %vm155_vm2, %v2991_v17  ;;  %4475 = vmatmul.mubr.msk.f32.vlgmr.msra.gmra.mxu0 %vm155_vm2, %v2845_v16 }
0x1307   :  { %4488 = vmatprep.subr.mxu0 %v4772_v0  ;;  %4478 = vmatpush3.msra.mxu1 %v5341_v36 }
0x1308   :  { %4489 = vmatpush3.msra.mxu0 %v5434_v30  ;;  %4479 = vmatprep.subr.mxu1 %v4772_v0 }
0x1309   :  { %4490 = vmatprep.subr.mxu0 %v4772_v0  ;;  %4496 = vmatprep.mubr.msk.f32.mxu0 %vm4773_vm1, %v4772_v0 }
0x130a   :  { %4491 = vmatpush3.msra.mxu0 %v5443_v47  ;;  %4480 = vmatpush3.msra.mxu1 %v5363_v23 }
0x130b   :  { %4492 = vmatprep.subr.mxu0 %v4772_v0  ;;  %4481 = vmatprep.subr.mxu1 %v4772_v0 }
0x130c   :  { %4493 = vmatpush3.msra.mxu0 %v5450_v48  ;;  %4482 = vmatpush3.msra.mxu1 %v5377_v25 }
0x130d   :  { %4494 = vmatprep.subr.mxu0 %v4772_v0  ;;  %4483 = vmatprep.subr.mxu1 %v4772_v0 }
0x130e   :  { %4495 = vmatpush3.msra.mxu0 %v5457_v4  ;;  %4484 = vmatpush3.msra.mxu1 %v5391_v31 }
0x130f   :  { %4510 = vmatprep.subr.mxu0 %v4772_v0  ;;  %4485 = vmatprep.mubr.msk.f32.mxu1 %vm4773_vm1, %v4772_v0 }
0x1310   :  { %4499 = vmatprep.subr.mxu1 %v4772_v0 }
0x13b5   :  { %v2835_v36 = vpop.f32.mrf.mxu0 }
0x13b6   :  { %v2840_v23 = vrot.slane %v2835_v36, 2 }
0x13b7   :  { %v4432_v30 = vpop.f32.mrf.mxu0 }
0x13b8   :  { %v2842_v25 = vadd.f32 %v2840_v23, %v4898_v10 }
0x13ba   :  { %4702 = vtanh.f32 %v2842_v25  ;;  %v3876_v7 = vmul.f32 -1.442695, %v2842_v25 }
0x13bb   :  { %v2914_v47 = vpop.f32.mrf.mxu1 }
0x13bd   :  { %v4443_v48 = vpop.f32.mrf.mxu1  ;;  %v2984_v18 = vpop.f32.mrf.mxu0 }
0x13be   :  { %v2985_v19 = vadd.f32 %v2984_v18, %v2914_v47 }
0x13bf   :  { %v4454_v4 = vpop.f32.mrf.mxu0 }
0x13c0   :  { %v2988_v31 = vadd.f32 %v5402_v51, %v2985_v19 }
0x13c2   :  { %4704 = vtanh.f32 %v2988_v31  ;;  %v3877_v41 = vmul.f32 -1.442695, %v2988_v31 }
0x13c6   :  { %v3060_v49 = vpop.f32.mrf.mxu1  ;;  %v3130_v22 = vpop.f32.mrf.mxu0 }
0x13c7   :  { %v4703_v12 = vpop.eup %4702  ;;  %v3131_v39 = vadd.f32 %v3130_v22, %v3060_v49 }
0x13c8   :  { %v4465_v40 = vpop.f32.mrf.mxu1  ;;  %v4476_v2 = vpop.f32.mrf.mxu0  ;;  %3147 = vrot.lane.b32.xlu0 %v4703_v12, %s4774_s17 }
0x13c9   :  { %v3134_v9 = vadd.f32 %v5551_v45, %v3131_v39 }
0x13cb   :  { %4706 = vtanh.f32 %v3134_v9  ;;  %v3878_v29 = vmul.f32 -1.442695, %v3134_v9 }
0x13cc   :  { %4708 = vpow2.f32 %v3876_v7 }
0x13cd   :  { %4710 = vpow2.f32 %v3877_v41 }
0x13ce   :  { %4712 = vpow2.f32 %v3878_v29 }
0x13cf   :  { %v4705_v10 = vpop.eup %4704 }
0x13d0   :  { %3171 = vrot.lane.b32.xlu1 %v4705_v10, %s4774_s17 }
0x13d8   :  { %v4707_v6 = vpop.eup %4706 }
0x13d9   :  { %3195 = vrot.lane.b32.xlu0 %v4707_v6, %s4774_s17  ;;  %v4709_v28 = vpop.eup %4708 }
0x13da   :  { %v3138_v33 = vadd.f32 1.0, %v4709_v28  ;;  %v4711_v38 = vpop.eup %4710 }
0x13db   :  { %v3165_v35 = vadd.f32 1.0, %v4711_v38  ;;  %v4713_v32 = vpop.eup %4712 }
0x13dc   :  { %4714 = vrcp.f32 %v3138_v33  ;;  %v3189_v42 = vadd.f32 1.0, %v4713_v32 }
0x13dd   :  { %4716 = vrcp.f32 %v3165_v35 }
0x13de   :  { %4718 = vrcp.f32 %v3189_v42 }
0x13e9   :  { %v4715_v34 = vpop.eup %4714 }
0x13ea   :  { %v4717_v46 = vpop.eup %4716  ;;  %v3145_v62 = vmul.f32 %v4715_v34, %v3143_v61 }
0x13eb   :  { %v4719_v21 = vpop.eup %4718  ;;  %v3169_v3 = vmul.f32 %v4717_v46, %v5564_v24 }
0x13ec   :  { %v3193_v20 = vmul.f32 %v4719_v21, %v5569_v5 }
0x143a   :  { %v3148_v1 = vpop.permute.xlu0 %3147 }
0x143b   :  { %v3150_v43 = vmul.f32 %v4715_v34, %v3148_v1 }
0x143d   :  { %3152 = vrot.lane.b32.xlu1 %v3150_v43, %s4775_s2 }
0x1442   :  { %v3172_v11 = vpop.permute.xlu1 %3171 }
0x1443   :  { %v3174_v37 = vmul.f32 %v4717_v46, %v3172_v11 }
0x1445   :  { %3176 = vrot.lane.b32.xlu0 %v3174_v37, %s4775_s2 }
0x144b   :  { %v3196_v60 = vpop.permute.xlu0 %3195 }
0x144c   :  { %v3198_v26 = vmul.f32 %v4719_v21, %v3196_v60 }
0x144e   :  { %3200 = vrot.lane.b32.xlu1 %v3198_v26, %s4775_s2 }
0x14af   :  { %v3153_v63 = vpop.permute.xlu1 %3152 }
0x14b0   :  { %v3155_v27 = vadd.f32 %v3153_v63, %v3145_v62 }
0x14b2   :  { %4720 = vtanh.f32 %v3155_v27 }
0x14b7   :  { %v3177_v8 = vpop.permute.xlu0 %3176 }
0x14b8   :  { %v5643_v13 = vadd.f32 %v3177_v8, %v3169_v3 }
0x14ba   :  { %4722 = vtanh.f32 %v5643_v13 }
0x14bf   :  { %v4721_v50 = vpop.eup %4720 }
0x14c0   :  { %v3201_v14 = vpop.permute.xlu1 %3200  ;;  %3158 = vrot.lane.b32.xlu0 %v4721_v50, %s4774_s17 }
0x14c1   :  { %v5648_v15 = vadd.f32 %v3201_v14, %v3193_v20 }
0x14c3   :  { %4724 = vtanh.f32 %v5648_v15 }
0x14c7   :  { %v4723_v58 = vpop.eup %4722 }
0x14c8   :  { %3182 = vrot.lane.b32.xlu1 %v4723_v58, %s4774_s17 }
0x14d0   :  { %v4725_v16 = vpop.eup %4724 }
0x14d1   :  { %3206 = vrot.lane.b32.xlu0 %v4725_v16, %s4774_s17 }
0x1532   :  { %v3159_v24 = vpop.permute.xlu0 %3158 }
0x1533   :  { %v3161_v17 = vmul.f32 %v4715_v34, %v3159_v24 }
0x1535   :  { %v3286_v36 = vrot.slane %v3161_v17, 6 }
0x1537   :  { %3287 = vrot.lane.b32.xlu0 %v3286_v36, %s4775_s2 }
0x153a   :  { %v3183_v23 = vpop.permute.xlu1 %3182 }
0x153b   :  { %v3185_v5 = vmul.f32 %v4717_v46, %v3183_v23 }
0x153d   :  { %3211 = vrot.lane.b32.xlu1 %v3185_v5, %s4775_s2  ;;  %v3733_v5 = vld [vmem:[%s5752_s10 + $0x10] sm:$0xff] }
0x1543   :  { %v3207_v30 = vpop.permute.xlu0 %3206 }
0x1544   :  { %v3209_v25 = vmul.f32 %v4719_v21, %v3207_v30  ;;  %v3732_v30 = vld [vmem:[%s5752_s10 + $0x8] sm:$0xff] }
0x1546   :  { %3363 = vrot.lane.b32.xlu1 %v3209_v25, %s4775_s2  ;;  %v3731_v25 = vld [vmem:[%s5752_s10] sm:$0xff] }
0x15a9   :  { %v3288_v47 = vpop.permute.xlu0 %3287 }
0x15aa   :  { %4497 = vmatmul.mubr.msk.f32.vlgmr.msra.gmra.mxu0 %vm155_vm2, %v3288_v47 }
0x15ab   :  { %4511 = vmatpush3.msra.mxu0 %v5472_v53  ;;  %4518 = vmatprep.mubr.msk.f32.mxu0 %vm4773_vm1, %v4772_v0 }
0x15ac   :  { %4512 = vmatprep.subr.mxu0 %v4772_v0 }
0x15ad   :  { %4513 = vmatpush3.msra.mxu0 %v5486_v44 }
0x15ae   :  { %4514 = vmatprep.subr.mxu0 %v4772_v0 }
0x15af   :  { %v3212_v48 = vpop.permute.xlu1 %3211  ;;  %4515 = vmatpush3.msra.mxu0 %v5500_v56 }
0x15b0   :  { %4486 = vmatmul.mubr.msk.f32.vlgmr.msra.gmra.mxu1 %vm155_vm2, %v3212_v48  ;;  %4516 = vmatprep.subr.mxu0 %v4772_v0 }
0x15b1   :  { %4500 = vmatpush3.msra.mxu1 %v5466_v52  ;;  %4517 = vmatpush3.msra.mxu0 %v5510_v57 }
0x15b2   :  { %4501 = vmatprep.subr.mxu1 %v4772_v0  ;;  %4519 = vmatmul.mubr.msk.f32.vlgmr.msra.gmra.mxu0 %vm155_vm2, %v3212_v48 }
0x15b3   :  { %4502 = vmatpush3.msra.mxu1 %v5480_v54  ;;  %4507 = vmatprep.mubr.msk.f32.mxu1 %vm4773_vm1, %v4772_v0 }
0x15b4   :  { %4503 = vmatprep.subr.mxu1 %v4772_v0  ;;  %4532 = vmatprep.subr.mxu0 %v4772_v0 }
0x15b5   :  { %4504 = vmatpush3.msra.mxu1 %v5494_v55  ;;  %4533 = vmatpush3.msra.mxu0 %v5472_v53 }
0x15b6   :  { %4505 = vmatprep.subr.mxu1 %v4772_v0  ;;  %4534 = vmatprep.subr.mxu0 %v4772_v0 }
0x15b7   :  { %4506 = vmatpush3.msra.mxu1 %v5516_v59  ;;  %4535 = vmatpush3.msra.mxu0 %v5486_v44 }
0x15b8   :  { %v3364_v18 = vpop.permute.xlu1 %3363  ;;  %4536 = vmatprep.subr.mxu0 %v4772_v0  ;;  %4540 = vmatprep.mubr.msk.f32.mxu0 %vm4773_vm1, %v4772_v0 }
0x15b9   :  { %4508 = vmatmul.mubr.msk.f32.vlgmr.msra.gmra.mxu1 %vm155_vm2, %v3364_v18  ;;  %4537 = vmatpush3.msra.mxu0 %v5500_v56 }
0x15ba   :  { %4538 = vmatprep.subr.mxu0 %v4772_v0  ;;  %4521 = vmatprep.subr.mxu1 %v4772_v0 }
0x15bb   :  { %4539 = vmatpush3.msra.mxu0 %v5510_v57  ;;  %4522 = vmatpush3.msra.mxu1 %v5466_v52 }
0x15bc   :  { %4523 = vmatprep.subr.mxu1 %v4772_v0  ;;  %4529 = vmatprep.mubr.msk.f32.mxu1 %vm4773_vm1, %v4772_v0 }
0x15bd   :  { %4524 = vmatpush3.msra.mxu1 %v5480_v54 }
0x15be   :  { %4525 = vmatprep.subr.mxu1 %v4772_v0 }
0x15bf   :  { %4526 = vmatpush3.msra.mxu1 %v5494_v55 }
0x15c0   :  { %4527 = vmatprep.subr.mxu1 %v4772_v0 }
0x15c1   :  { %4528 = vmatpush3.msra.mxu1 %v5516_v59 }
0x15c2   :  { %4543 = vmatprep.subr.mxu1 %v4772_v0 }
0x166a   :  { %v3357_v53 = vpop.f32.mrf.mxu0 }
0x166c   :  { %v4498_v44 = vpop.f32.mrf.mxu0 }
0x166d   :  { %v3888_v44 = vld [vmem:[%s5753_s11] ss:$0 sm:$0xff] }
0x1670   :  { %v3281_v52 = vpop.f32.mrf.mxu1 }
0x1671   :  { %v3358_v56 = vadd.f32 %v3357_v53, %v3281_v52 }
0x1672   :  { %v4487_v57 = vpop.f32.mrf.mxu1  ;;  %v3503_v19 = vpop.f32.mrf.mxu0 }
0x1673   :  { %v3361_v4 = vadd.f32 %v5402_v51, %v3358_v56 }
0x1674   :  { %v4520_v31 = vpop.f32.mrf.mxu0 }
0x1675   :  { %4726 = vtanh.f32 %v3361_v4  ;;  %v3883_v39 = vmul.f32 -1.442695, %v3361_v4 }
0x1679   :  { %v3433_v54 = vpop.f32.mrf.mxu1 }
0x167a   :  { %v3504_v49 = vadd.f32 %v3503_v19, %v3433_v54 }
0x167b   :  { %v4509_v22 = vpop.f32.mrf.mxu1 }
0x167c   :  { %v3507_v55 = vadd.f32 %v5551_v45, %v3504_v49 }
0x167e   :  { %4728 = vtanh.f32 %v3507_v55  ;;  %v3884_v40 = vmul.f32 -1.442695, %v3507_v55 }
0x167f   :  { %4730 = vpow2.f32 %v3883_v39 }
0x1680   :  { %4732 = vpow2.f32 %v3884_v40 }
0x1682   :  { %v4727_v12 = vpop.eup %4726 }
0x1683   :  { %3517 = vrot.lane.b32.xlu0 %v4727_v12, %s4774_s17 }
0x168b   :  { %v4729_v59 = vpop.eup %4728 }
0x168c   :  { %3541 = vrot.lane.b32.xlu1 %v4729_v59, %s4774_s17  ;;  %v4731_v2 = vpop.eup %4730 }
0x168d   :  { %v3511_v51 = vadd.f32 1.0, %v4731_v2  ;;  %v4733_v9 = vpop.eup %4732 }
0x168e   :  { %v3535_v10 = vadd.f32 1.0, %v4733_v9 }
0x168f   :  { %4734 = vrcp.f32 %v3511_v51 }
0x1690   :  { %4736 = vrcp.f32 %v3535_v10 }
0x169c   :  { %v4735_v6 = vpop.eup %4734 }
0x169d   :  { %v4737_v28 = vpop.eup %4736  ;;  %v3515_v38 = vmul.f32 %v4735_v6, %v5643_v13 }
0x169e   :  { %v3539_v34 = vmul.f32 %v4737_v28, %v5648_v15 }
0x16f5   :  { %v3518_v7 = vpop.permute.xlu0 %3517 }
0x16f6   :  { %v3520_v41 = vmul.f32 %v4735_v6, %v3518_v7 }
0x16f8   :  { %3522 = vrot.lane.b32.xlu0 %v3520_v41, %s4775_s2 }
0x16fe   :  { %v3542_v29 = vpop.permute.xlu1 %3541 }
0x16ff   :  { %v3544_v33 = vmul.f32 %v4737_v28, %v3542_v29 }
0x1701   :  { %3546 = vrot.lane.b32.xlu1 %v3544_v33, %s4775_s2 }
0x176a   :  { %v3523_v35 = vpop.permute.xlu0 %3522 }
0x176b   :  { %v3525_v32 = vadd.f32 %v3523_v35, %v3515_v38 }
0x176d   :  { %4738 = vtanh.f32 %v3525_v32 }
0x1773   :  { %v3547_v42 = vpop.permute.xlu1 %3546 }
0x1774   :  { %v3549_v1 = vadd.f32 %v3547_v42, %v3539_v34 }
0x1776   :  { %4740 = vtanh.f32 %v3549_v1 }
0x177a   :  { %v4739_v43 = vpop.eup %4738 }
0x177b   :  { %3528 = vrot.lane.b32.xlu0 %v4739_v43, %s4774_s17 }
0x1783   :  { %v4741_v46 = vpop.eup %4740 }
0x1784   :  { %3552 = vrot.lane.b32.xlu1 %v4741_v46, %s4774_s17 }
0x17ed   :  { %v3529_v11 = vpop.permute.xlu0 %3528 }
0x17ee   :  { %v3531_v37 = vmul.f32 %v4735_v6, %v3529_v11 }
0x17f0   :  { %3632 = vrot.lane.b32.xlu1 %v3531_v37, %s4775_s2 }
0x17f6   :  { %v3553_v21 = vpop.permute.xlu1 %3552 }
0x17f7   :  { %v3555_v60 = vmul.f32 %v4737_v28, %v3553_v21 }
0x17f9   :  { %3557 = vrot.lane.b32.xlu0 %v3555_v60, %s4775_s2 }
0x1862   :  { %v3633_v26 = vpop.permute.xlu1 %3632 }
0x1863   :  { %4541 = vmatmul.mubr.msk.f32.vlgmr.msra.gmra.mxu0 %vm155_vm2, %v3633_v26 }
0x186b   :  { %v3558_v61 = vpop.permute.xlu0 %3557 }
0x186c   :  { %4530 = vmatmul.mubr.msk.f32.vlgmr.msra.gmra.mxu1 %vm155_vm2, %v3558_v61 }
0x186d   :  { %4551 = vmatprep.mubr.msk.f32.mxu1 %vm4773_vm1, %v4772_v0 }
0x1923   :  { %v3702_v62 = vpop.f32.mrf.mxu0 }
0x1925   :  { %v4542_v63 = vpop.f32.mrf.mxu0 }
0x192c   :  { %v3627_v27 = vpop.f32.mrf.mxu1 }
0x192d   :  { %v3703_v3 = vadd.f32 %v3702_v62, %v3627_v27 }
0x192e   :  { %v4531_v8 = vpop.f32.mrf.mxu1 }
0x192f   :  { %v3706_v13 = vadd.f32 %v5551_v45, %v3703_v3  ;;  %v3734_v45 = vld [vmem:[%s5752_s10 + $0x18] sm:$0xff] }
0x1930   :  { %4544 = vmatpush3.msra.mxu1 %v3734_v45 }
0x1931   :  { %4742 = vtanh.f32 %v3706_v13  ;;  %v3887_v20 = vmul.f32 -1.442695, %v3706_v13  ;;  %4545 = vmatprep.subr.mxu1 %v4772_v0 }
0x1932   :  { %4546 = vmatpush3.msra.mxu1 %v3733_v5 }
0x1933   :  { %4744 = vpow2.f32 %v3887_v20  ;;  %4547 = vmatprep.subr.mxu1 %v4772_v0 }
0x1934   :  { %4548 = vmatpush3.msra.mxu1 %v3732_v30 }
0x1935   :  { %4549 = vmatprep.subr.mxu1 %v4772_v0 }
0x1936   :  { %4550 = vmatpush3.msra.mxu1 %v3731_v25 }
0x193e   :  { %v4743_v50 = vpop.eup %4742 }
0x193f   :  { %3716 = vrot.lane.b32.xlu0 %v4743_v50, %s4774_s17 }
0x1940   :  { %v4745_v14 = vpop.eup %4744 }
0x1941   :  { %v3710_v15 = vadd.f32 1.0, %v4745_v14 }
0x1943   :  { %4746 = vrcp.f32 %v3710_v15 }
0x1950   :  { %v4747_v58 = vpop.eup %4746 }
0x1951   :  { %v3714_v17 = vmul.f32 %v4747_v58, %v3549_v1 }
0x19b1   :  { %v3717_v16 = vpop.permute.xlu0 %3716 }
0x19b2   :  { %v3719_v24 = vmul.f32 %v4747_v58, %v3717_v16 }
0x19b4   :  { %3721 = vrot.lane.b32.xlu1 %v3719_v24, %s4775_s2 }
0x1a26   :  { %v3722_v36 = vpop.permute.xlu1 %3721 }
0x1a27   :  { %v3724_v23 = vadd.f32 %v3722_v36, %v3714_v17 }
0x1a29   :  { %4748 = vtanh.f32 %v3724_v23 }
0x1a36   :  { %v4749_v47 = vpop.eup %4748 }
0x1a37   :  { %3727 = vrot.lane.b32.xlu0 %v4749_v47, %s4774_s17 }
0x1aa9   :  { %v3728_v48 = vpop.permute.xlu0 %3727 }
0x1aaa   :  { %v3730_v18 = vmul.f32 %v4747_v58, %v3728_v48 }
0x1aac   :  { %3743 = vrot.lane.b32.xlu1 %v3730_v18, %s4775_s2 }
0x1b1e   :  { %v3744_v53 = vpop.permute.xlu1 %3743 }
0x1b1f   :  { %4552 = vmatmul.mubr.msk.f32.vlgmr.msra.gmra.mxu1 %vm155_vm2, %v3744_v53 }
0x1bdf   :  { %v3813_v52 = vpop.f32.mrf.mxu1 }
0x1be0   :  { %v3814_v56 = vadd.f32 %v3888_v44, %v3813_v52 }
0x1be1   :  { %v4553_v57 = vpop.f32.mrf.mxu1 }
0x1be2   :  { %3817 = vst [vmem:[%s5754_s12] sm:$0x3] %v3814_v56 }

</bundles_post_ra>
